<compile_context>
chip_gen: v6e
topology: v6e:2x2x1
jax: 0.10.0
libtpu: 0.0.40
codegen_flags: <defaults>
</compile_context>

<pallas_src>
import math

import jax
import jax.numpy as jnp
from jax import lax
from jax.experimental import pallas as pl
from jax.experimental.pallas import tpu as pltpu


# ----------------------------- Pallas kernels -----------------------------

def _ds_conv_kernel(a_ref, b_ref, w01_ref, w2_ref, bias_ref, o_ref):
    """3x3 / stride-2 conv on a tile of `th` output rows.

    a_ref    : (1, th, 2, W2, 2C)  main window (th row pairs; lanes = [even|odd] cols)
    b_ref    : (1, 1, 1, W2, 2C)   boundary even row (row pair i*th + th)
    w01_ref  : (3, 2C, Cout)       kw=0/1 weights packed along Cin (K = 2C dot)
    w2_ref   : (3, C, Cout)        kw=2 weights (K = C dot)
    bias_ref : (1, Cout)           f32 bias
    o_ref    : (1, th, Wo, Cout)
    """
    _, th, _, _w2p, twoc = a_ref.shape
    _, _, wo, cout = o_ref.shape
    c = twoc // 2

    rows_e = a_ref[0, :, 0]          # (th, W2, 2C)  even input rows (kh=0; kh=2 of prev row)
    rows_o = a_ref[0, :, 1]          # (th, W2, 2C)  odd  input rows (kh=1)
    row_b = b_ref[0, 0, 0]           # (W2, 2C)      boundary even row (kh=2 of last tile row)

    def taps_dot(rows, kh, m):
        # kw=0 and kw=1 live in the two lane halves -> single K=2C MXU dot.
        d = jnp.dot(rows[:, :wo, :].reshape(m * wo, twoc), w01_ref[kh],
                    preferred_element_type=jnp.float32)
        # kw=2 is the even half of the *next* column pair -> K=C dot.
        d = d + jnp.dot(rows[:, 1:, :c].reshape(m * wo, c), w2_ref[kh],
                        preferred_element_type=jnp.float32)
        return d

    bias = bias_ref[...].astype(jnp.float32)                   # (1, Cout), broadcasts
    acc = taps_dot(rows_e, 0, th) + taps_dot(rows_o, 1, th) + bias

    # kh=2 taps of output row ii come from the even row of pair ii+1.  Split the
    # accumulation (tile body + boundary row) instead of materializing a shifted
    # copy of the whole even-row window with a concatenate.
    bot = acc[(th - 1) * wo:] + taps_dot(row_b[None], 2, 1)
    o_ref[0, th - 1:, :, :] = bot.reshape(1, wo, cout).astype(o_ref.dtype)
    if th > 1:
        top = acc[: (th - 1) * wo] + taps_dot(rows_e[1:], 2, th - 1)
        o_ref[0, : th - 1, :, :] = top.reshape(th - 1, wo, cout).astype(o_ref.dtype)


def _avgpool_kernel(x_ref, o_ref):
    """2x2 / stride-2 average pool on a tile of `th` output rows.

    x_ref : (1, th, 2, Wh, 2C)   lanes = [even cols | odd cols]
    o_ref : (1, th, Wh, C)
    """
    c = o_ref.shape[-1]
    a = x_ref[0].astype(jnp.float32)                            # (th, 2, Wh, 2C)
    s = (a[:, 0, :, :c] + a[:, 0, :, c:]) + (a[:, 1, :, :c] + a[:, 1, :, c:])
    o_ref[...] = (0.25 * s)[None].astype(o_ref.dtype)


# ------------------------------- helpers -----------------------------------

def _vmem_budget():
    """(capacity, vmem_limit, tile_budget) sized per TPU generation."""
    cap = 64 * 1024 * 1024                       # conservative fallback (v7x per-TC VMEM)
    try:
        cap = int(pltpu.get_tpu_info().vmem_capacity_bytes)
    except Exception:
        pass
    limit = min(cap // 2, 64 * 1024 * 1024)      # 64 MiB on v5e/v6e, 32 MiB on v7x
    budget = min(3 * cap // 8, 48 * 1024 * 1024) # 48 MiB on v5e/v6e, 24 MiB on v7x
    return cap, limit, budget


def _pick_row_tile(n_rows, per_row_bytes, fixed_bytes=0, budget_bytes=24 << 20,
                   max_rows=None):
    """Largest row tile whose working set fits the budget (>=1; any value, not
    just divisors of n_rows -- the wrappers pad/slice the remainder)."""
    avail = budget_bytes - fixed_bytes           # may be <=0 if weights alone exceed budget
    th = avail // max(per_row_bytes, 1)
    if max_rows is not None:
        th = min(th, max_rows)
    return int(max(1, min(th, n_rows)))


_SINGLE_BUFFER_CONSTS = [hasattr(pl, "Buffered")]


def _const_spec(block_shape, index_map, single_buffer):
    """BlockSpec for grid-constant operands; single-buffered when supported."""
    if single_buffer:
        return pl.BlockSpec(block_shape, index_map, pipeline_mode=pl.Buffered(1))
    return pl.BlockSpec(block_shape, index_map)


# ------------------------------- wrappers ---------------------------------

def downsample_conv(x_nchw, weight_oihw, bias, row_tile=None):
    """pad=(0,1,0,1) zero pad, then Conv2d(C, Cout, kernel=3, stride=2, pad=0)."""
    N, C, H, W = x_nchw.shape
    Cout = weight_oihw.shape[0]
    Ho = (H - 2) // 2 + 1
    Wo = (W - 2) // 2 + 1
    W2 = Wo + 1
    isz = jnp.dtype(x_nchw.dtype).itemsize

    # NCHW -> NHWC (channels on lanes).
    # TODO(synk): callers that keep activations NHWC end-to-end can drop both transposes.
    x = jnp.transpose(x_nchw, (0, 2, 3, 1))

    # Weights (Cout, Cin, kh, kw) -> per-kh slabs; kw=0/1 packed along Cin so the
    # lane halves feed one K=2C MXU dot.  Cast to the activation dtype (bf16 models
    # get native bf16 MXU passes); bias stays f32 for the accumulator.
    wt = jnp.transpose(weight_oihw, (2, 3, 1, 0)).astype(x.dtype)   # (3, 3, C, Cout)
    w01 = jnp.concatenate([wt[:, 0], wt[:, 1]], axis=1)             # (3, 2C, Cout)
    w2w = wt[:, 2]                                                   # (3, C,  Cout)
    b2 = bias.reshape(1, Cout).astype(jnp.float32)

    cap, limit, budget = _vmem_budget()
    wsz = jnp.dtype(x.dtype).itemsize
    fixed = (2 * 9 * C * Cout * wsz          # weights (counted double-buffered, conservative)
             + 2 * (W2 * 2 * C) * isz        # boundary row, double-buffered
             + 2 * Cout * 4)
    per_row = (2 * (2 * W2 * 2 * C) * isz    # main window, double-buffered
               + 2 * Wo * Cout * isz         # output tile, double-buffered
               + Wo * Cout * 4               # f32 accumulator
               + 3 * Wo * 2 * C * 4)         # reshaped f32 tap intermediates (rough)
    th = row_tile or _pick_row_tile(Ho, per_row, fixed_bytes=fixed, budget_bytes=budget,
                                    max_rows=max(1, 2048 // max(Wo, 1)))
    th = max(1, min(int(th), Ho))
    nh = int(pl.cdiv(Ho, th))
    Ho_pad = nh * th                         # remainder rows computed on zero pad, sliced off
    H2p = Ho_pad + 1

    # Zero pad right/bottom (covers PyTorch's (0,1,0,1) pad + remainder rows), then a
    # free contiguous reshape folds the column parity into the lane axis.
    xp = jnp.pad(x, ((0, 0), (0, 2 * H2p - H), (0, 2 * W2 - W), (0, 0)))
    xr = xp.reshape(N, H2p, 2, W2, 2 * C)

    # Guard: if the fixed footprint alone exceeds the budget, raise the limit.
    vmem_limit = int(max(limit, min(cap, fixed + th * per_row + (8 << 20))))

    def run(single_buf_consts):
        in_specs = [
            # main window: th row pairs starting at pair i*th
            pl.BlockSpec((1, th, 2, W2, 2 * C), lambda n, i: (n, i, 0, 0, 0)),
            # boundary even row: pair i*th + th, parity 0
            pl.BlockSpec((1, 1, 1, W2, 2 * C), lambda n, i: (n, i * th + th, 0, 0, 0)),
            # grid-constant operands
            _const_spec((3, 2 * C, Cout), lambda n, i: (0, 0, 0), single_buf_consts),
            _const_spec((3, C, Cout), lambda n, i: (0, 0, 0), single_buf_consts),
            _const_spec((1, Cout), lambda n, i: (0, 0), single_buf_consts),
        ]
        return pl.pallas_call(
            _ds_conv_kernel,
            out_shape=jax.ShapeDtypeStruct((N, Ho_pad, Wo, Cout), x.dtype),
            grid_spec=pltpu.PrefetchScalarGridSpec(
                num_scalar_prefetch=0,
                grid=(N, nh),
                in_specs=in_specs,
                out_specs=pl.BlockSpec((1, th, Wo, Cout), lambda n, i: (n, i, 0, 0)),
            ),
            compiler_params=pltpu.CompilerParams(
                dimension_semantics=("parallel", "parallel"),
                vmem_limit_bytes=vmem_limit),
        )(xr, xr, w01, w2w, b2)

    if _SINGLE_BUFFER_CONSTS[0]:
        try:
            out = run(True)
        except Exception:      # pl.Buffered(1) not supported by this JAX -> default buffering
            _SINGLE_BUFFER_CONSTS[0] = False
            out = run(False)
    else:
        out = run(False)

    out = out[:, :Ho]
    # TODO(synk): for Cout < 128 a lane-dense (Wo*Cout) output slab would avoid masked stores.
    return jnp.transpose(out, (0, 3, 1, 2))        # back to NCHW


def downsample_avgpool(x_nchw, row_tile=None):
    """avg_pool2d(kernel_size=2, stride=2)."""
    N, C, H, W = x_nchw.shape
    Hh, Wh = H // 2, W // 2
    isz = jnp.dtype(x_nchw.dtype).itemsize

    # TODO(synk): callers that keep activations NHWC end-to-end can drop both transposes.
    x = jnp.transpose(x_nchw, (0, 2, 3, 1))[:, :2 * Hh, :2 * Wh, :]   # drop odd remainder

    cap, limit, budget = _vmem_budget()
    per_row = (2 * (2 * Wh * 2 * C) * isz    # input window, double-buffered
               + 2 * Wh * C * isz            # output tile, double-buffered
               + 2 * Wh * 2 * C * 4)         # f32 intermediates
    th = row_tile or _pick_row_tile(Hh, per_row, budget_bytes=budget)
    th = max(1, min(int(th), Hh))
    nh = int(pl.cdiv(Hh, th))
    Hh_pad = nh * th

    xp = jnp.pad(x, ((0, 0), (0, 2 * (Hh_pad - Hh)), (0, 0), (0, 0)))
    xr = xp.reshape(N, Hh_pad, 2, Wh, 2 * C)         # column parity folded into lanes

    vmem_limit = int(max(limit, min(cap, th * per_row + (8 << 20))))

    out = pl.pallas_call(
        _avgpool_kernel,
        out_shape=jax.ShapeDtypeStruct((N, Hh_pad, Wh, C), x.dtype),
        grid_spec=pltpu.PrefetchScalarGridSpec(
            num_scalar_prefetch=0,
            grid=(N, nh),
            in_specs=[pl.BlockSpec((1, th, 2, Wh, 2 * C),
                                   lambda n, i: (n, i, 0, 0, 0))],
            out_specs=pl.BlockSpec((1, th, Wh, C), lambda n, i: (n, i, 0, 0)),
        ),
        compiler_params=pltpu.CompilerParams(
            dimension_semantics=("parallel", "parallel"),
            vmem_limit_bytes=vmem_limit),
    )(xr)
    out = out[:, :Hh]
    return jnp.transpose(out, (0, 3, 1, 2))          # back to NCHW


class Downsample:
    """JAX/Pallas port of the PyTorch Downsample module."""

    def __init__(self, in_channels, with_conv, key=None):
        self.with_conv = with_conv
        if self.with_conv:
            key = jax.random.PRNGKey(0) if key is None else key
            kw, kb = jax.random.split(key)
            fan_in = in_channels * 3 * 3
            bound = 1.0 / math.sqrt(fan_in)  # PyTorch Conv2d default init range
            self.weight = jax.random.uniform(
                kw, (in_channels, in_channels, 3, 3), jnp.float32, -bound, bound)
            self.bias = jax.random.uniform(
                kb, (in_channels,), jnp.float32, -bound, bound)

    def __call__(self, x):
        if self.with_conv:
            return downsample_conv(x, self.weight, self.bias)
        return downsample_avgpool(x)


# --------------------------------- main ------------------------------------

if __name__ == "__main__":
    N, C, H, W = 2, 4, 16, 16
    x = jax.random.normal(jax.random.PRNGKey(0), (N, C, H, W), jnp.float32)

    # with_conv=True path
    mod_conv = Downsample(C, with_conv=True)
    y_conv = jax.block_until_ready(mod_conv(x))
    assert y_conv.shape == (N, C, 8, 8), y_conv.shape

    # pure-JAX reference: asymmetric (0,1,0,1) pad + strided conv
    xp = jnp.pad(x, ((0, 0), (0, 0), (0, 1), (0, 1)))
    ref_conv = lax.conv_general_dilated(
        xp, mod_conv.weight, window_strides=(2, 2), padding="VALID",
        dimension_numbers=("NCHW", "OIHW", "NCHW"),
    ) + mod_conv.bias[None, :, None, None]
    assert jnp.allclose(y_conv, ref_conv, atol=1e-4, rtol=1e-4)

    # exercise multi-tile and remainder-tile (th does not divide Ho) code paths
    for rt in (1, 3):
        y_rt = jax.block_until_ready(
            downsample_conv(x, mod_conv.weight, mod_conv.bias, row_tile=rt))
        assert jnp.allclose(y_rt, ref_conv, atol=1e-4, rtol=1e-4)

    # with_conv=False path (avg_pool2d 2x2, stride 2)
    mod_pool = Downsample(C, with_conv=False)
    y_pool = jax.block_until_ready(mod_pool(x))
    assert y_pool.shape == (N, C, 8, 8), y_pool.shape
    ref_pool = x.reshape(N, C, 8, 2, 8, 2).mean(axis=(3, 5))
    assert jnp.allclose(y_pool, ref_pool, atol=1e-5, rtol=1e-5)

    y_pool3 = jax.block_until_ready(downsample_avgpool(x, row_tile=3))
    assert jnp.allclose(y_pool3, ref_pool, atol=1e-5, rtol=1e-5)

    print("KERNEL_OK")
</pallas_src>

<mosaic_0001>
module attributes {stable_mosaic.version = 11 : i64} {
  func.func @_ds_conv_kernel(%arg0: i32, %arg1: i32, %arg2: memref<1x8x2x9x8xf32, #tpu.memory_space<vmem>>, %arg3: memref<1x1x1x9x8xf32, #tpu.memory_space<vmem>>, %arg4: memref<3x8x4xf32, #tpu.memory_space<vmem>>, %arg5: memref<3x4x4xf32, #tpu.memory_space<vmem>>, %arg6: memref<1x4xf32, #tpu.memory_space<vmem>>, %arg7: memref<1x8x8x4xf32, #tpu.memory_space<vmem>>) attributes {dimension_semantics = [#tpu.dimension_semantics<parallel>, #tpu.dimension_semantics<parallel>], iteration_bounds = array<i64: 2, 1>, scalar_prefetch = 0 : i64, scratch_operands = 0 : i64, tpu.core_type = #tpu.core_type<tc>, window_params = [{transform_indices = @transform_0, window_bounds = array<i64: 1, 8, 2, 9, 8>}, {transform_indices = @transform_1, window_bounds = array<i64: 1, 1, 1, 9, 8>}, {pipeline_mode = #tpu.pipeline_mode<synchronous>, transform_indices = @transform_2, window_bounds = array<i64: 3, 8, 4>}, {pipeline_mode = #tpu.pipeline_mode<synchronous>, transform_indices = @transform_3, window_bounds = array<i64: 3, 4, 4>}, {pipeline_mode = #tpu.pipeline_mode<synchronous>, transform_indices = @transform_4, window_bounds = array<i64: 1, 4>}, {transform_indices = @transform_5, window_bounds = array<i64: 1, 8, 8, 4>}]} {
    %c0 = arith.constant 0 : index
    %c0_0 = arith.constant 0 : index
    %c0_1 = arith.constant 0 : index
    %c0_2 = arith.constant 0 : index
    %c0_3 = arith.constant 0 : index
    %0 = vector.load %arg2[%c0, %c0_0, %c0_1, %c0_2, %c0_3] : memref<1x8x2x9x8xf32, #tpu.memory_space<vmem>>, vector<1x8x1x9x8xf32>
    %1 = vector.shape_cast %0 : vector<1x8x1x9x8xf32> to vector<8x9x8xf32>
    %c0_4 = arith.constant 0 : index
    %c0_5 = arith.constant 0 : index
    %c1 = arith.constant 1 : index
    %c0_6 = arith.constant 0 : index
    %c0_7 = arith.constant 0 : index
    %2 = vector.load %arg2[%c0_4, %c0_5, %c1, %c0_6, %c0_7] : memref<1x8x2x9x8xf32, #tpu.memory_space<vmem>>, vector<1x8x1x9x8xf32>
    %3 = vector.shape_cast %2 : vector<1x8x1x9x8xf32> to vector<8x9x8xf32>
    %c0_8 = arith.constant 0 : index
    %c0_9 = arith.constant 0 : index
    %c0_10 = arith.constant 0 : index
    %c0_11 = arith.constant 0 : index
    %c0_12 = arith.constant 0 : index
    %4 = vector.load %arg3[%c0_8, %c0_9, %c0_10, %c0_11, %c0_12] : memref<1x1x1x9x8xf32, #tpu.memory_space<vmem>>, vector<1x1x1x9x8xf32>
    %5 = vector.shape_cast %4 : vector<1x1x1x9x8xf32> to vector<9x8xf32>
    %c0_13 = arith.constant 0 : index
    %c0_14 = arith.constant 0 : index
    %6 = vector.load %arg6[%c0_13, %c0_14] : memref<1x4xf32, #tpu.memory_space<vmem>>, vector<1x4xf32>
    %7 = vector.extract_strided_slice %1 {offsets = [0, 0, 0], sizes = [8, 8, 8], strides = [1, 1, 1]} : vector<8x9x8xf32> to vector<8x8x8xf32>
    %8 = vector.shape_cast %7 : vector<8x8x8xf32> to vector<64x8xf32>
    %c0_15 = arith.constant 0 : index
    %c0_16 = arith.constant 0 : index
    %c0_17 = arith.constant 0 : index
    %9 = vector.load %arg4[%c0_15, %c0_16, %c0_17] : memref<3x8x4xf32, #tpu.memory_space<vmem>>, vector<1x8x4xf32>
    %10 = vector.shape_cast %9 : vector<1x8x4xf32> to vector<8x4xf32>
    %cst = arith.constant dense<0.000000e+00> : vector<64x4xf32>
    %11 = tpu.matmul %8, %10, %cst {dimension_numbers = #tpu.dot_dimension_numbers<[1], [0], [0], [1], [0, 0, 1, 1], [], []>} : vector<64x8xf32>, vector<8x4xf32>, vector<64x4xf32> -> vector<64x4xf32>
    %12 = vector.extract_strided_slice %1 {offsets = [0, 1, 0], sizes = [8, 8, 4], strides = [1, 1, 1]} : vector<8x9x8xf32> to vector<8x8x4xf32>
    %13 = vector.shape_cast %12 : vector<8x8x4xf32> to vector<64x4xf32>
    %c0_18 = arith.constant 0 : index
    %c0_19 = arith.constant 0 : index
    %c0_20 = arith.constant 0 : index
    %14 = vector.load %arg5[%c0_18, %c0_19, %c0_20] : memref<3x4x4xf32, #tpu.memory_space<vmem>>, vector<1x4x4xf32>
    %15 = vector.shape_cast %14 : vector<1x4x4xf32> to vector<4x4xf32>
    %cst_21 = arith.constant dense<0.000000e+00> : vector<64x4xf32>
    %16 = tpu.matmul %13, %15, %cst_21 {dimension_numbers = #tpu.dot_dimension_numbers<[1], [0], [0], [1], [0, 0, 1, 1], [], []>} : vector<64x4xf32>, vector<4x4xf32>, vector<64x4xf32> -> vector<64x4xf32>
    %17 = arith.addf %11, %16 : vector<64x4xf32>
    %18 = vector.extract_strided_slice %3 {offsets = [0, 0, 0], sizes = [8, 8, 8], strides = [1, 1, 1]} : vector<8x9x8xf32> to vector<8x8x8xf32>
    %19 = vector.shape_cast %18 : vector<8x8x8xf32> to vector<64x8xf32>
    %c1_22 = arith.constant 1 : index
    %c0_23 = arith.constant 0 : index
    %c0_24 = arith.constant 0 : index
    %20 = vector.load %arg4[%c1_22, %c0_23, %c0_24] : memref<3x8x4xf32, #tpu.memory_space<vmem>>, vector<1x8x4xf32>
    %21 = vector.shape_cast %20 : vector<1x8x4xf32> to vector<8x4xf32>
    %cst_25 = arith.constant dense<0.000000e+00> : vector<64x4xf32>
    %22 = tpu.matmul %19, %21, %cst_25 {dimension_numbers = #tpu.dot_dimension_numbers<[1], [0], [0], [1], [0, 0, 1, 1], [], []>} : vector<64x8xf32>, vector<8x4xf32>, vector<64x4xf32> -> vector<64x4xf32>
    %23 = vector.extract_strided_slice %3 {offsets = [0, 1, 0], sizes = [8, 8, 4], strides = [1, 1, 1]} : vector<8x9x8xf32> to vector<8x8x4xf32>
    %24 = vector.shape_cast %23 : vector<8x8x4xf32> to vector<64x4xf32>
    %c1_26 = arith.constant 1 : index
    %c0_27 = arith.constant 0 : index
    %c0_28 = arith.constant 0 : index
    %25 = vector.load %arg5[%c1_26, %c0_27, %c0_28] : memref<3x4x4xf32, #tpu.memory_space<vmem>>, vector<1x4x4xf32>
    %26 = vector.shape_cast %25 : vector<1x4x4xf32> to vector<4x4xf32>
    %cst_29 = arith.constant dense<0.000000e+00> : vector<64x4xf32>
    %27 = tpu.matmul %24, %26, %cst_29 {dimension_numbers = #tpu.dot_dimension_numbers<[1], [0], [0], [1], [0, 0, 1, 1], [], []>} : vector<64x4xf32>, vector<4x4xf32>, vector<64x4xf32> -> vector<64x4xf32>
    %28 = arith.addf %22, %27 : vector<64x4xf32>
    %29 = arith.addf %17, %28 : vector<64x4xf32>
    %30 = vector.broadcast %6 : vector<1x4xf32> to vector<64x4xf32>
    %31 = arith.addf %29, %30 : vector<64x4xf32>
    %32 = vector.extract_strided_slice %31 {offsets = [56, 0], sizes = [8, 4], strides = [1, 1]} : vector<64x4xf32> to vector<8x4xf32>
    %33 = vector.shape_cast %5 : vector<9x8xf32> to vector<1x9x8xf32>
    %34 = vector.extract_strided_slice %33 {offsets = [0, 0, 0], sizes = [1, 8, 8], strides = [1, 1, 1]} : vector<1x9x8xf32> to vector<1x8x8xf32>
    %35 = vector.shape_cast %34 : vector<1x8x8xf32> to vector<8x8xf32>
    %c2 = arith.constant 2 : index
    %c0_30 = arith.constant 0 : index
    %c0_31 = arith.constant 0 : index
    %36 = vector.load %arg4[%c2, %c0_30, %c0_31] : memref<3x8x4xf32, #tpu.memory_space<vmem>>, vector<1x8x4xf32>
    %37 = vector.shape_cast %36 : vector<1x8x4xf32> to vector<8x4xf32>
    %cst_32 = arith.constant dense<0.000000e+00> : vector<8x4xf32>
    %38 = tpu.matmul %35, %37, %cst_32 {dimension_numbers = #tpu.dot_dimension_numbers<[1], [0], [0], [1], [0, 0, 1, 1], [], []>} : vector<8x8xf32>, vector<8x4xf32>, vector<8x4xf32> -> vector<8x4xf32>
    %39 = vector.extract_strided_slice %33 {offsets = [0, 1, 0], sizes = [1, 8, 4], strides = [1, 1, 1]} : vector<1x9x8xf32> to vector<1x8x4xf32>
    %40 = vector.shape_cast %39 : vector<1x8x4xf32> to vector<8x4xf32>
    %c2_33 = arith.constant 2 : index
    %c0_34 = arith.constant 0 : index
    %c0_35 = arith.constant 0 : index
    %41 = vector.load %arg5[%c2_33, %c0_34, %c0_35] : memref<3x4x4xf32, #tpu.memory_space<vmem>>, vector<1x4x4xf32>
    %42 = vector.shape_cast %41 : vector<1x4x4xf32> to vector<4x4xf32>
    %cst_36 = arith.constant dense<0.000000e+00> : vector<8x4xf32>
    %43 = tpu.matmul %40, %42, %cst_36 {dimension_numbers = #tpu.dot_dimension_numbers<[1], [0], [0], [1], [0, 0, 1, 1], [], []>} : vector<8x4xf32>, vector<4x4xf32>, vector<8x4xf32> -> vector<8x4xf32>
    %44 = arith.addf %38, %43 : vector<8x4xf32>
    %45 = arith.addf %32, %44 : vector<8x4xf32>
    %46 = vector.shape_cast %45 : vector<8x4xf32> to vector<1x8x4xf32>
    %c0_37 = arith.constant 0 : index
    %c7 = arith.constant 7 : index
    %c0_38 = arith.constant 0 : index
    %c0_39 = arith.constant 0 : index
    %47 = vector.load %arg7[%c0_37, %c7, %c0_38, %c0_39] : memref<1x8x8x4xf32, #tpu.memory_space<vmem>>, vector<1x1x8x4xf32>
    %48 = vector.shape_cast %47 : vector<1x1x8x4xf32> to vector<1x8x4xf32>
    %49 = vector.shape_cast %46 : vector<1x8x4xf32> to vector<1x1x8x4xf32>
    tpu.vector_store %arg7[%c0_37, %c7, %c0_38, %c0_39], %49 {strides = array<i32>} : memref<1x8x8x4xf32, #tpu.memory_space<vmem>>, vector<1x1x8x4xf32>,
    %50 = vector.extract_strided_slice %31 {offsets = [0, 0], sizes = [56, 4], strides = [1, 1]} : vector<64x4xf32> to vector<56x4xf32>
    %51 = vector.extract_strided_slice %1 {offsets = [1, 0, 0], sizes = [7, 9, 8], strides = [1, 1, 1]} : vector<8x9x8xf32> to vector<7x9x8xf32>
    %52 = vector.extract_strided_slice %51 {offsets = [0, 0, 0], sizes = [7, 8, 8], strides = [1, 1, 1]} : vector<7x9x8xf32> to vector<7x8x8xf32>
    %53 = vector.shape_cast %52 : vector<7x8x8xf32> to vector<56x8xf32>
    %c2_40 = arith.constant 2 : index
    %c0_41 = arith.constant 0 : index
    %c0_42 = arith.constant 0 : index
    %54 = vector.load %arg4[%c2_40, %c0_41, %c0_42] : memref<3x8x4xf32, #tpu.memory_space<vmem>>, vector<1x8x4xf32>
    %55 = vector.shape_cast %54 : vector<1x8x4xf32> to vector<8x4xf32>
    %cst_43 = arith.constant dense<0.000000e+00> : vector<56x4xf32>
    %56 = tpu.matmul %53, %55, %cst_43 {dimension_numbers = #tpu.dot_dimension_numbers<[1], [0], [0], [1], [0, 0, 1, 1], [], []>} : vector<56x8xf32>, vector<8x4xf32>, vector<56x4xf32> -> vector<56x4xf32>
    %57 = vector.extract_strided_slice %51 {offsets = [0, 1, 0], sizes = [7, 8, 4], strides = [1, 1, 1]} : vector<7x9x8xf32> to vector<7x8x4xf32>
    %58 = vector.shape_cast %57 : vector<7x8x4xf32> to vector<56x4xf32>
    %c2_44 = arith.constant 2 : index
    %c0_45 = arith.constant 0 : index
    %c0_46 = arith.constant 0 : index
    %59 = vector.load %arg5[%c2_44, %c0_45, %c0_46] : memref<3x4x4xf32, #tpu.memory_space<vmem>>, vector<1x4x4xf32>
    %60 = vector.shape_cast %59 : vector<1x4x4xf32> to vector<4x4xf32>
    %cst_47 = arith.constant dense<0.000000e+00> : vector<56x4xf32>
    %61 = tpu.matmul %58, %60, %cst_47 {dimension_numbers = #tpu.dot_dimension_numbers<[1], [0], [0], [1], [0, 0, 1, 1], [], []>} : vector<56x4xf32>, vector<4x4xf32>, vector<56x4xf32> -> vector<56x4xf32>
    %62 = arith.addf %56, %61 : vector<56x4xf32>
    %63 = arith.addf %50, %62 : vector<56x4xf32>
    %64 = vector.shape_cast %63 : vector<56x4xf32> to vector<7x8x4xf32>
    %c0_48 = arith.constant 0 : index
    %c0_49 = arith.constant 0 : index
    %c0_50 = arith.constant 0 : index
    %c0_51 = arith.constant 0 : index
    %65 = vector.load %arg7[%c0_48, %c0_49, %c0_50, %c0_51] : memref<1x8x8x4xf32, #tpu.memory_space<vmem>>, vector<1x7x8x4xf32>
    %66 = vector.shape_cast %65 : vector<1x7x8x4xf32> to vector<7x8x4xf32>
    %67 = vector.shape_cast %64 : vector<7x8x4xf32> to vector<1x7x8x4xf32>
    tpu.vector_store %arg7[%c0_48, %c0_49, %c0_50, %c0_51], %67 {strides = array<i32>} : memref<1x8x8x4xf32, #tpu.memory_space<vmem>>, vector<1x7x8x4xf32>,
    return
  }
  func.func @transform_0(%arg0: i32, %arg1: i32) -> (i32, i32, i32, i32, i32) {
    %c0_i32 = arith.constant 0 : i32
    %c0_i32_0 = arith.constant 0 : i32
    %c0_i32_1 = arith.constant 0 : i32
    %c0_i32_2 = arith.constant 0 : i32
    return %arg0, %arg1, %c0_i32, %c0_i32_0, %c0_i32_1 : i32, i32, i32, i32, i32
  }
  func.func @transform_1(%arg0: i32, %arg1: i32) -> (i32, i32, i32, i32, i32) {
    %c8_i32 = arith.constant 8 : i32
    %0 = arith.muli %arg1, %c8_i32 : i32
    %c8_i32_0 = arith.constant 8 : i32
    %1 = arith.addi %0, %c8_i32_0 : i32
    %c0_i32 = arith.constant 0 : i32
    %c0_i32_1 = arith.constant 0 : i32
    %c0_i32_2 = arith.constant 0 : i32
    %c0_i32_3 = arith.constant 0 : i32
    return %arg0, %1, %c0_i32, %c0_i32_1, %c0_i32_2 : i32, i32, i32, i32, i32
  }
  func.func @transform_2(%arg0: i32, %arg1: i32) -> (i32, i32, i32) {
    %c0_i32 = arith.constant 0 : i32
    %c0_i32_0 = arith.constant 0 : i32
    %c0_i32_1 = arith.constant 0 : i32
    %c0_i32_2 = arith.constant 0 : i32
    return %c0_i32, %c0_i32_0, %c0_i32_1 : i32, i32, i32
  }
  func.func @transform_3(%arg0: i32, %arg1: i32) -> (i32, i32, i32) {
    %c0_i32 = arith.constant 0 : i32
    %c0_i32_0 = arith.constant 0 : i32
    %c0_i32_1 = arith.constant 0 : i32
    %c0_i32_2 = arith.constant 0 : i32
    return %c0_i32, %c0_i32_0, %c0_i32_1 : i32, i32, i32
  }
  func.func @transform_4(%arg0: i32, %arg1: i32) -> (i32, i32) {
    %c0_i32 = arith.constant 0 : i32
    %c0_i32_0 = arith.constant 0 : i32
    %c0_i32_1 = arith.constant 0 : i32
    return %c0_i32, %c0_i32_0 : i32, i32
  }
  func.func @transform_5(%arg0: i32, %arg1: i32) -> (i32, i32, i32, i32) {
    %c0_i32 = arith.constant 0 : i32
    %c0_i32_0 = arith.constant 0 : i32
    %c0_i32_1 = arith.constant 0 : i32
    return %arg0, %arg1, %c0_i32, %c0_i32_0 : i32, i32, i32, i32
  }
}

module attributes {stable_mosaic.version = 11 : i64} {
  func.func @_ds_conv_kernel(%arg0: i32, %arg1: i32, %arg2: memref<1x8x2x9x8xf32, #tpu.memory_space<vmem>>, %arg3: memref<1x1x1x9x8xf32, #tpu.memory_space<vmem>>, %arg4: memref<3x8x4xf32, #tpu.memory_space<vmem>>, %arg5: memref<3x4x4xf32, #tpu.memory_space<vmem>>, %arg6: memref<1x4xf32, #tpu.memory_space<vmem>>, %arg7: memref<1x8x8x4xf32, #tpu.memory_space<vmem>>) attributes {dimension_semantics = [#tpu.dimension_semantics<parallel>, #tpu.dimension_semantics<parallel>], iteration_bounds = array<i64: 2, 1>, scalar_prefetch = 0 : i64, scratch_operands = 0 : i64, tpu.core_type = #tpu.core_type<tc>, window_params = [{transform_indices = @transform_0, window_bounds = array<i64: 1, 8, 2, 9, 8>}, {transform_indices = @transform_1, window_bounds = array<i64: 1, 1, 1, 9, 8>}, {pipeline_mode = #tpu.pipeline_mode<synchronous>, transform_indices = @transform_2, window_bounds = array<i64: 3, 8, 4>}, {pipeline_mode = #tpu.pipeline_mode<synchronous>, transform_indices = @transform_3, window_bounds = array<i64: 3, 4, 4>}, {pipeline_mode = #tpu.pipeline_mode<synchronous>, transform_indices = @transform_4, window_bounds = array<i64: 1, 4>}, {transform_indices = @transform_5, window_bounds = array<i64: 1, 8, 8, 4>}]} {
    %c0 = arith.constant 0 : index
    %c0_0 = arith.constant 0 : index
    %c0_1 = arith.constant 0 : index
    %c0_2 = arith.constant 0 : index
    %c0_3 = arith.constant 0 : index
    %0 = vector.load %arg2[%c0, %c0_0, %c0_1, %c0_2, %c0_3] : memref<1x8x2x9x8xf32, #tpu.memory_space<vmem>>, vector<1x8x1x9x8xf32>
    %1 = vector.shape_cast %0 : vector<1x8x1x9x8xf32> to vector<8x9x8xf32>
    %c0_4 = arith.constant 0 : index
    %c0_5 = arith.constant 0 : index
    %c1 = arith.constant 1 : index
    %c0_6 = arith.constant 0 : index
    %c0_7 = arith.constant 0 : index
    %2 = vector.load %arg2[%c0_4, %c0_5, %c1, %c0_6, %c0_7] : memref<1x8x2x9x8xf32, #tpu.memory_space<vmem>>, vector<1x8x1x9x8xf32>
    %3 = vector.shape_cast %2 : vector<1x8x1x9x8xf32> to vector<8x9x8xf32>
    %c0_8 = arith.constant 0 : index
    %c0_9 = arith.constant 0 : index
    %c0_10 = arith.constant 0 : index
    %c0_11 = arith.constant 0 : index
    %c0_12 = arith.constant 0 : index
    %4 = vector.load %arg3[%c0_8, %c0_9, %c0_10, %c0_11, %c0_12] : memref<1x1x1x9x8xf32, #tpu.memory_space<vmem>>, vector<1x1x1x9x8xf32>
    %5 = vector.shape_cast %4 : vector<1x1x1x9x8xf32> to vector<9x8xf32>
    %c0_13 = arith.constant 0 : index
    %c0_14 = arith.constant 0 : index
    %6 = vector.load %arg6[%c0_13, %c0_14] : memref<1x4xf32, #tpu.memory_space<vmem>>, vector<1x4xf32>
    %7 = vector.extract_strided_slice %1 {offsets = [0, 0, 0], sizes = [8, 8, 8], strides = [1, 1, 1]} : vector<8x9x8xf32> to vector<8x8x8xf32>
    %8 = vector.shape_cast %7 : vector<8x8x8xf32> to vector<64x8xf32>
    %c0_15 = arith.constant 0 : index
    %c0_16 = arith.constant 0 : index
    %c0_17 = arith.constant 0 : index
    %9 = vector.load %arg4[%c0_15, %c0_16, %c0_17] : memref<3x8x4xf32, #tpu.memory_space<vmem>>, vector<1x8x4xf32>
    %10 = vector.shape_cast %9 : vector<1x8x4xf32> to vector<8x4xf32>
    %cst = arith.constant dense<0.000000e+00> : vector<64x4xf32>
    %11 = tpu.matmul %8, %10, %cst {dimension_numbers = #tpu.dot_dimension_numbers<[1], [0], [0], [1], [0, 0, 1, 1], [], []>} : vector<64x8xf32>, vector<8x4xf32>, vector<64x4xf32> -> vector<64x4xf32>
    %12 = vector.extract_strided_slice %1 {offsets = [0, 1, 0], sizes = [8, 8, 4], strides = [1, 1, 1]} : vector<8x9x8xf32> to vector<8x8x4xf32>
    %13 = vector.shape_cast %12 : vector<8x8x4xf32> to vector<64x4xf32>
    %c0_18 = arith.constant 0 : index
    %c0_19 = arith.constant 0 : index
    %c0_20 = arith.constant 0 : index
    %14 = vector.load %arg5[%c0_18, %c0_19, %c0_20] : memref<3x4x4xf32, #tpu.memory_space<vmem>>, vector<1x4x4xf32>
    %15 = vector.shape_cast %14 : vector<1x4x4xf32> to vector<4x4xf32>
    %cst_21 = arith.constant dense<0.000000e+00> : vector<64x4xf32>
    %16 = tpu.matmul %13, %15, %cst_21 {dimension_numbers = #tpu.dot_dimension_numbers<[1], [0], [0], [1], [0, 0, 1, 1], [], []>} : vector<64x4xf32>, vector<4x4xf32>, vector<64x4xf32> -> vector<64x4xf32>
    %17 = arith.addf %11, %16 : vector<64x4xf32>
    %18 = vector.extract_strided_slice %3 {offsets = [0, 0, 0], sizes = [8, 8, 8], strides = [1, 1, 1]} : vector<8x9x8xf32> to vector<8x8x8xf32>
    %19 = vector.shape_cast %18 : vector<8x8x8xf32> to vector<64x8xf32>
    %c1_22 = arith.constant 1 : index
    %c0_23 = arith.constant 0 : index
    %c0_24 = arith.constant 0 : index
    %20 = vector.load %arg4[%c1_22, %c0_23, %c0_24] : memref<3x8x4xf32, #tpu.memory_space<vmem>>, vector<1x8x4xf32>
    %21 = vector.shape_cast %20 : vector<1x8x4xf32> to vector<8x4xf32>
    %cst_25 = arith.constant dense<0.000000e+00> : vector<64x4xf32>
    %22 = tpu.matmul %19, %21, %cst_25 {dimension_numbers = #tpu.dot_dimension_numbers<[1], [0], [0], [1], [0, 0, 1, 1], [], []>} : vector<64x8xf32>, vector<8x4xf32>, vector<64x4xf32> -> vector<64x4xf32>
    %23 = vector.extract_strided_slice %3 {offsets = [0, 1, 0], sizes = [8, 8, 4], strides = [1, 1, 1]} : vector<8x9x8xf32> to vector<8x8x4xf32>
    %24 = vector.shape_cast %23 : vector<8x8x4xf32> to vector<64x4xf32>
    %c1_26 = arith.constant 1 : index
    %c0_27 = arith.constant 0 : index
    %c0_28 = arith.constant 0 : index
    %25 = vector.load %arg5[%c1_26, %c0_27, %c0_28] : memref<3x4x4xf32, #tpu.memory_space<vmem>>, vector<1x4x4xf32>
    %26 = vector.shape_cast %25 : vector<1x4x4xf32> to vector<4x4xf32>
    %cst_29 = arith.constant dense<0.000000e+00> : vector<64x4xf32>
    %27 = tpu.matmul %24, %26, %cst_29 {dimension_numbers = #tpu.dot_dimension_numbers<[1], [0], [0], [1], [0, 0, 1, 1], [], []>} : vector<64x4xf32>, vector<4x4xf32>, vector<64x4xf32> -> vector<64x4xf32>
    %28 = arith.addf %22, %27 : vector<64x4xf32>
    %29 = arith.addf %17, %28 : vector<64x4xf32>
    %30 = vector.broadcast %6 : vector<1x4xf32> to vector<64x4xf32>
    %31 = arith.addf %29, %30 : vector<64x4xf32>
    %32 = vector.extract_strided_slice %31 {offsets = [56, 0], sizes = [8, 4], strides = [1, 1]} : vector<64x4xf32> to vector<8x4xf32>
    %33 = vector.shape_cast %5 : vector<9x8xf32> to vector<1x9x8xf32>
    %34 = vector.extract_strided_slice %33 {offsets = [0, 0, 0], sizes = [1, 8, 8], strides = [1, 1, 1]} : vector<1x9x8xf32> to vector<1x8x8xf32>
    %35 = vector.shape_cast %34 : vector<1x8x8xf32> to vector<8x8xf32>
    %c2 = arith.constant 2 : index
    %c0_30 = arith.constant 0 : index
    %c0_31 = arith.constant 0 : index
    %36 = vector.load %arg4[%c2, %c0_30, %c0_31] : memref<3x8x4xf32, #tpu.memory_space<vmem>>, vector<1x8x4xf32>
    %37 = vector.shape_cast %36 : vector<1x8x4xf32> to vector<8x4xf32>
    %cst_32 = arith.constant dense<0.000000e+00> : vector<8x4xf32>
    %38 = tpu.matmul %35, %37, %cst_32 {dimension_numbers = #tpu.dot_dimension_numbers<[1], [0], [0], [1], [0, 0, 1, 1], [], []>} : vector<8x8xf32>, vector<8x4xf32>, vector<8x4xf32> -> vector<8x4xf32>
    %39 = vector.extract_strided_slice %33 {offsets = [0, 1, 0], sizes = [1, 8, 4], strides = [1, 1, 1]} : vector<1x9x8xf32> to vector<1x8x4xf32>
    %40 = vector.shape_cast %39 : vector<1x8x4xf32> to vector<8x4xf32>
    %c2_33 = arith.constant 2 : index
    %c0_34 = arith.constant 0 : index
    %c0_35 = arith.constant 0 : index
    %41 = vector.load %arg5[%c2_33, %c0_34, %c0_35] : memref<3x4x4xf32, #tpu.memory_space<vmem>>, vector<1x4x4xf32>
    %42 = vector.shape_cast %41 : vector<1x4x4xf32> to vector<4x4xf32>
    %cst_36 = arith.constant dense<0.000000e+00> : vector<8x4xf32>
    %43 = tpu.matmul %40, %42, %cst_36 {dimension_numbers = #tpu.dot_dimension_numbers<[1], [0], [0], [1], [0, 0, 1, 1], [], []>} : vector<8x4xf32>, vector<4x4xf32>, vector<8x4xf32> -> vector<8x4xf32>
    %44 = arith.addf %38, %43 : vector<8x4xf32>
    %45 = arith.addf %32, %44 : vector<8x4xf32>
    %46 = vector.shape_cast %45 : vector<8x4xf32> to vector<1x8x4xf32>
    %c0_37 = arith.constant 0 : index
    %c7 = arith.constant 7 : index
    %c0_38 = arith.constant 0 : index
    %c0_39 = arith.constant 0 : index
    %47 = vector.load %arg7[%c0_37, %c7, %c0_38, %c0_39] : memref<1x8x8x4xf32, #tpu.memory_space<vmem>>, vector<1x1x8x4xf32>
    %48 = vector.shape_cast %47 : vector<1x1x8x4xf32> to vector<1x8x4xf32>
    %49 = vector.shape_cast %46 : vector<1x8x4xf32> to vector<1x1x8x4xf32>
    tpu.vector_store %arg7[%c0_37, %c7, %c0_38, %c0_39], %49 {strides = array<i32>} : memref<1x8x8x4xf32, #tpu.memory_space<vmem>>, vector<1x1x8x4xf32>,
    %50 = vector.extract_strided_slice %31 {offsets = [0, 0], sizes = [56, 4], strides = [1, 1]} : vector<64x4xf32> to vector<56x4xf32>
    %51 = vector.extract_strided_slice %1 {offsets = [1, 0, 0], sizes = [7, 9, 8], strides = [1, 1, 1]} : vector<8x9x8xf32> to vector<7x9x8xf32>
    %52 = vector.extract_strided_slice %51 {offsets = [0, 0, 0], sizes = [7, 8, 8], strides = [1, 1, 1]} : vector<7x9x8xf32> to vector<7x8x8xf32>
    %53 = vector.shape_cast %52 : vector<7x8x8xf32> to vector<56x8xf32>
    %c2_40 = arith.constant 2 : index
    %c0_41 = arith.constant 0 : index
    %c0_42 = arith.constant 0 : index
    %54 = vector.load %arg4[%c2_40, %c0_41, %c0_42] : memref<3x8x4xf32, #tpu.memory_space<vmem>>, vector<1x8x4xf32>
    %55 = vector.shape_cast %54 : vector<1x8x4xf32> to vector<8x4xf32>
    %cst_43 = arith.constant dense<0.000000e+00> : vector<56x4xf32>
    %56 = tpu.matmul %53, %55, %cst_43 {dimension_numbers = #tpu.dot_dimension_numbers<[1], [0], [0], [1], [0, 0, 1, 1], [], []>} : vector<56x8xf32>, vector<8x4xf32>, vector<56x4xf32> -> vector<56x4xf32>
    %57 = vector.extract_strided_slice %51 {offsets = [0, 1, 0], sizes = [7, 8, 4], strides = [1, 1, 1]} : vector<7x9x8xf32> to vector<7x8x4xf32>
    %58 = vector.shape_cast %57 : vector<7x8x4xf32> to vector<56x4xf32>
    %c2_44 = arith.constant 2 : index
    %c0_45 = arith.constant 0 : index
    %c0_46 = arith.constant 0 : index
    %59 = vector.load %arg5[%c2_44, %c0_45, %c0_46] : memref<3x4x4xf32, #tpu.memory_space<vmem>>, vector<1x4x4xf32>
    %60 = vector.shape_cast %59 : vector<1x4x4xf32> to vector<4x4xf32>
    %cst_47 = arith.constant dense<0.000000e+00> : vector<56x4xf32>
    %61 = tpu.matmul %58, %60, %cst_47 {dimension_numbers = #tpu.dot_dimension_numbers<[1], [0], [0], [1], [0, 0, 1, 1], [], []>} : vector<56x4xf32>, vector<4x4xf32>, vector<56x4xf32> -> vector<56x4xf32>
    %62 = arith.addf %56, %61 : vector<56x4xf32>
    %63 = arith.addf %50, %62 : vector<56x4xf32>
    %64 = vector.shape_cast %63 : vector<56x4xf32> to vector<7x8x4xf32>
    %c0_48 = arith.constant 0 : index
    %c0_49 = arith.constant 0 : index
    %c0_50 = arith.constant 0 : index
    %c0_51 = arith.constant 0 : index
    %65 = vector.load %arg7[%c0_48, %c0_49, %c0_50, %c0_51] : memref<1x8x8x4xf32, #tpu.memory_space<vmem>>, vector<1x7x8x4xf32>
    %66 = vector.shape_cast %65 : vector<1x7x8x4xf32> to vector<7x8x4xf32>
    %67 = vector.shape_cast %64 : vector<7x8x4xf32> to vector<1x7x8x4xf32>
    tpu.vector_store %arg7[%c0_48, %c0_49, %c0_50, %c0_51], %67 {strides = array<i32>} : memref<1x8x8x4xf32, #tpu.memory_space<vmem>>, vector<1x7x8x4xf32>,
    return
  }
  func.func @transform_0(%arg0: i32, %arg1: i32) -> (i32, i32, i32, i32, i32) {
    %c0_i32 = arith.constant 0 : i32
    %c0_i32_0 = arith.constant 0 : i32
    %c0_i32_1 = arith.constant 0 : i32
    %c0_i32_2 = arith.constant 0 : i32
    return %arg0, %arg1, %c0_i32, %c0_i32_0, %c0_i32_1 : i32, i32, i32, i32, i32
  }
  func.func @transform_1(%arg0: i32, %arg1: i32) -> (i32, i32, i32, i32, i32) {
    %c8_i32 = arith.constant 8 : i32
    %0 = arith.muli %arg1, %c8_i32 : i32
    %c8_i32_0 = arith.constant 8 : i32
    %1 = arith.addi %0, %c8_i32_0 : i32
    %c0_i32 = arith.constant 0 : i32
    %c0_i32_1 = arith.constant 0 : i32
    %c0_i32_2 = arith.constant 0 : i32
    %c0_i32_3 = arith.constant 0 : i32
    return %arg0, %1, %c0_i32, %c0_i32_1, %c0_i32_2 : i32, i32, i32, i32, i32
  }
  func.func @transform_2(%arg0: i32, %arg1: i32) -> (i32, i32, i32) {
    %c0_i32 = arith.constant 0 : i32
    %c0_i32_0 = arith.constant 0 : i32
    %c0_i32_1 = arith.constant 0 : i32
    %c0_i32_2 = arith.constant 0 : i32
    return %c0_i32, %c0_i32_0, %c0_i32_1 : i32, i32, i32
  }
  func.func @transform_3(%arg0: i32, %arg1: i32) -> (i32, i32, i32) {
    %c0_i32 = arith.constant 0 : i32
    %c0_i32_0 = arith.constant 0 : i32
    %c0_i32_1 = arith.constant 0 : i32
    %c0_i32_2 = arith.constant 0 : i32
    return %c0_i32, %c0_i32_0, %c0_i32_1 : i32, i32, i32
  }
  func.func @transform_4(%arg0: i32, %arg1: i32) -> (i32, i32) {
    %c0_i32 = arith.constant 0 : i32
    %c0_i32_0 = arith.constant 0 : i32
    %c0_i32_1 = arith.constant 0 : i32
    return %c0_i32, %c0_i32_0 : i32, i32
  }
  func.func @transform_5(%arg0: i32, %arg1: i32) -> (i32, i32, i32, i32) {
    %c0_i32 = arith.constant 0 : i32
    %c0_i32_0 = arith.constant 0 : i32
    %c0_i32_1 = arith.constant 0 : i32
    return %arg0, %arg1, %c0_i32, %c0_i32_0 : i32, i32, i32, i32
  }
}

</mosaic_0001>

<bundles_post_ra>
// kernel: tpu_custom_call.1
= control target key start
LH: loop header
LB: loop body
LE: loop exit
PB: predicated region body
PF: predicated region fallthrough
CT: control target
= control target key end

     0   :  { %s1815_s18 = smov 0   ;;  %s1817_s19 = smov 0   ;;  %s2148_s0 = inlined_call_operand.vmem [shape: f32[2,9,2,9,8], index: 0, kind: input, shape index: {}]   ;;  %s2149_s1 = inlined_call_operand.vmem [shape: f32[2,9,2,9,8], index: 1, kind: input, shape index: {}]   ;;  %s2150_s2 = inlined_call_operand.vmem [shape: f32[3,8,4], index: 2, kind: input, shape index: {}]   ;;  %s2151_s3 = inlined_call_operand.vmem [shape: f32[3,4,4], index: 3, kind: input, shape index: {}]   ;;  %s2152_s4 = inlined_call_operand.vmem [shape: f32[1,4], index: 4, kind: input, shape index: {}]   ;;  %s2153_s5 = inlined_call_operand.vmem [shape: f32[2,8,8,4], index: 5, kind: output, shape index: {}]  }
   0x1   :  { %s1819_s20 = smov 0  }
   0x2 LB: > { %s27_s21 = sadd.s32 1, %s1777_s19  ;;  %p1476_p0 = scmp.ge.s32.totalorder %s1781_s20, 1  ;;  %s1781_s20 = sphi %s1819_s20, %s15_s20   ;;  %s1777_s19 = sphi %s1817_s19, %s2155_s19   ;;  %s1773_s18 = sphi %s1815_s18, %s2154_s18  }
   0x3   : > { %p29_p1 = scmp.ge.s32.totalorder %s27_s21, 2  ;;  %p245_p2 = scmp.lt.s32.totalorder %s1781_s20, 3 }
   0x5   : > { %s2157_s21 = smov (%p29_p1, %s27_s21), 0  ;;  %p246_p3 = pnand %p1476_p0, %p245_p2 }
   0x6   : > { %p306_p4 = scmp.lt.s32.totalorder (!%p246_p3), %s1773_s18, 1 }
   0x7   : > { %249 = sbr.rel (%p246_p3) target bundleno = 279 (0x117), region = 40 }
   0xc   : > { %v381_v0 = vld [vmem:[%s2150_s2] sm:$0xff]  ;;  %vm441_vm0 = vcmask 1043456   ;;  %v1514_v3 = vld [vmem:[%s2150_s2 + $0x8] sm:$0xff]  ;;  %s2159_s18 = smov (!%p306_p4, %s1773_s18), 1  ;;  %vm550_vm1 = vcmask 64512   ;;  %vm398_vm2 = vcmask 1046528  }
   0xd   : > { %v423_v1 = vld [vmem:[%s2151_s3] sm:$0xf]  ;;  %1632 = vmatprep.subr.mxu1 %v381_v0  ;;  %v1515_v2 = vld [vmem:[%s2151_s3 + $0x4] sm:$0xf]  ;;  %s1730_s30 = smul.u32 288, %s2159_s18  ;;  %vm424_vm3 = vcmask 31744  }
   0xe   : > { %1618 = vmatprep.subr.msk.mxu0 %vm441_vm0, %v423_v1  ;;  %1633 = vmatpush3.msra.mxu1 %v381_v0  ;;  %v1783_v27 = vmov 0.0   ;;  %v1534_v58 = vld [vmem:[%s2150_s2 + $0x10] sm:$0xff]  ;;  %v1535_v0 = vld [vmem:[%s2151_s3 + $0x8] sm:$0xf]  ;;  %vm1784_vm4 = vmmov 0   ;;  %s1561_s23 = sshll.u32 %s2159_s18, 6 }
   0xf   : > { %1619 = vmatpush3.msk.msra.mxu0 %vm441_vm0, %v423_v1  ;;  %1660 = vmatprep.subr.mxu1 %v1514_v3  ;;  %s1856_s8 = scalar_lea.vmem %s2148_s0, %s1730_s30  ;;  %s1560_s13 = sadd.s32 256, %s1730_s30 }
  0x10   : > { %1646 = vmatprep.subr.msk.mxu0 %vm441_vm0, %v1515_v2  ;;  %v345_v4 = vld [vmem:[%s1856_s8] sm:$0xff]  ;;  %v346_v6 = vld [vmem:[%s1856_s8 + $0x8] sm:$0x1]  ;;  %v1481_v40 = vld [vmem:[%s1856_s8 + $0x10] sm:$0xff]  ;;  %s332_s16 = scalar_lea.vmem %s2149_s1, %s1560_s13  ;;  %s2103_s28 = scalar_lea.vmem %s2153_s5, %s1561_s23 }
  0x11   : > { %v1860_v5 = vld [vmem:[%s1856_s8 + $0x20] sm:$0xff]  ;;  %v399_v7 = vrot.slane %v345_v4, 1  ;;  %1634 = vmatprep.mubr.msk.f32.mxu1 %vm550_vm1, %v345_v4  ;;  %v400_v9 = vrot.slane %v346_v6, 1  ;;  %v348_v10 = vld [vmem:[%s1856_s8 + $0x28] sm:$0x1]  ;;  %v690_v46 = vrot.slane %v1481_v40, 1 }
  0x12   : > { %v402_v8 = vrot.slane %v1860_v5, 1  ;;  %v1867_v11 = vld [vmem:[%s1856_s8 + $0x40] sm:$0xff]  ;;  %1635 = vmatmul.mubr.msk.f32.vlgmr.msra.gmra.mxu1 %vm550_vm1, %v1860_v5  ;;  %v403_v12 = vrot.slane %v348_v10, 1  ;;  %v350_v15 = vld [vmem:[%s1856_s8 + $0x48] sm:$0x1]  ;;  %v1483_v47 = vld [vmem:[%s1856_s8 + $0x30] sm:$0xff] }
  0x13   : > { %v405_v13 = vrot.slane %v1867_v11, 1  ;;  %v1873_v14 = vld [vmem:[%s1856_s8 + $0x60] sm:$0xff]  ;;  %v401_v17 = vsel %vm398_vm2, %v399_v7, %v400_v9  ;;  %1661 = vmatpush3.msra.mxu1 %v1514_v3  ;;  %1637 = vmatprep.mubr.msk.f32.mxu1 %vm550_vm1, %v1867_v11  ;;  %v406_v19 = vrot.slane %v350_v15, 1  ;;  %v352_v20 = vld [vmem:[%s1856_s8 + $0x68] sm:$0x1]  ;;  %v1485_v50 = vld [vmem:[%s1856_s8 + $0x50] sm:$0xff] }
  0x14   : > { %v1877_v16 = vld [vmem:[%s1856_s8 + $0x80] sm:$0xff]  ;;  %v408_v18 = vrot.slane %v1873_v14, 1  ;;  %1620 = vmatprep.mubr.msk.f32.mxu0 %vm424_vm3, %v401_v17  ;;  %v1890_v23 = vsel %vm398_vm2, %v402_v8, %v403_v12  ;;  %v409_v24 = vrot.slane %v352_v20, 1  ;;  %v354_v25 = vld [vmem:[%s1856_s8 + $0x88] sm:$0x1]  ;;  %1679 = vmatprep.subr.mxu1 %v1783_v27  ;;  %v693_v53 = vrot.slane %v1483_v47, 1 }
  0x15   : > { %v411_v21 = vrot.slane %v1877_v16, 1  ;;  %v1886_v22 = vld [vmem:[%s1856_s8 + $0xa0] sm:$0xff]  ;;  %v356_v26 = vld [vmem:[%s1856_s8 + $0xa8] sm:$0x1]  ;;  %1621 = vmatmul.mubr.msk.f32.vlgmr.msra.gmra.mxu0 %vm424_vm3, %v1890_v23  ;;  %v1898_v28 = vsel %vm398_vm2, %v405_v13, %v406_v19  ;;  %v412_v29 = vrot.slane %v354_v25, 1  ;;  %v1487_v56 = vld [vmem:[%s1856_s8 + $0x70] sm:$0xff] }
  0x16   : > { %v1901_v30 = vld [vmem:[%s1856_s8 + $0xc0] sm:$0xff]  ;;  %v358_v31 = vld [vmem:[%s1856_s8 + $0xc8] sm:$0x1]  ;;  %1647 = vmatpush3.msk.msra.mxu0 %vm441_vm0, %v1515_v2  ;;  %1638 = vmatmul.mubr.msk.f32.gmra.mxu1 %vm550_vm1, %v1873_v14  ;;  %v1908_v32 = vsel %vm398_vm2, %v408_v18, %v409_v24  ;;  %v414_v33 = vrot.slane %v1886_v22, 1  ;;  %v415_v34 = vrot.slane %v356_v26, 1  ;;  %v696_v59 = vrot.slane %v1485_v50, 1 }
  0x17   : > { %1623 = vmatprep.mubr.msk.f32.mxu0 %vm424_vm3, %v1898_v28  ;;  %1640 = vmatprep.mubr.msk.f32.mxu1 %vm550_vm1, %v1877_v16  ;;  %v1916_v35 = vsel %vm398_vm2, %v411_v21, %v412_v29  ;;  %v417_v36 = vrot.slane %v1901_v30, 1  ;;  %v1920_v37 = vld [vmem:[%s1856_s8 + $0xe0] sm:$0xff]  ;;  %v418_v38 = vrot.slane %v358_v31, 1  ;;  %v360_v39 = vld [vmem:[%s1856_s8 + $0xe8] sm:$0x1]  ;;  %v1489_v61 = vld [vmem:[%s1856_s8 + $0x90] sm:$0xff] }
  0x18   : > { %v1482_v41 = vld [vmem:[%s1856_s8 + $0x18] sm:$0x1]  ;;  %1674 = vmatprep.subr.mxu0 %v1783_v27  ;;  %v1933_v42 = vsel %vm398_vm2, %v414_v33, %v415_v34  ;;  %v420_v43 = vrot.slane %v1920_v37, 1  ;;  %v421_v44 = vrot.slane %v360_v39, 1  ;;  %v699_v1 = vrot.slane %v1487_v56, 1  ;;  %v1491_v4 = vld [vmem:[%s1856_s8 + $0xb0] sm:$0xff] }
  0x19   : > { %1624 = vmatmul.mubr.msk.f32.gmra.mxu0 %vm424_vm3, %v1908_v32  ;;  %v1939_v45 = vsel %vm398_vm2, %v417_v36, %v418_v38  ;;  %v691_v48 = vrot.slane %v1482_v41, 1  ;;  %v1484_v49 = vld [vmem:[%s1856_s8 + $0x38] sm:$0x1]  ;;  %v702_v3 = vrot.slane %v1489_v61, 1  ;;  %v1493_v9 = vld [vmem:[%s1856_s8 + $0xd0] sm:$0xff]  ;;  %v705_v13 = vrot.slane %v1491_v4, 1 }
  0x1a   : > { %1641 = vmatmul.mubr.msk.f32.gmra.mxu1 %vm550_vm1, %v1886_v22  ;;  %1626 = vmatprep.mubr.msk.f32.mxu0 %vm424_vm3, %v1916_v35  ;;  %v1486_v51 = vld [vmem:[%s1856_s8 + $0x58] sm:$0x1]  ;;  %v1952_v52 = vsel %vm398_vm2, %v420_v43, %v421_v44  ;;  %v694_v54 = vrot.slane %v1484_v49, 1  ;;  %v708_v18 = vrot.slane %v1493_v9, 1  ;;  %v1495_v19 = vld [vmem:[%s1856_s8 + $0xf0] sm:$0xff]  ;;  %v378_v31 = vld [vmem:[%s332_s16] sm:$0xff] }
  0x1b   : > { %1643 = vmatprep.mubr.msk.f32.mxu1 %vm550_vm1, %v1901_v30  ;;  %v692_v55 = vsel %vm398_vm2, %v690_v46, %v691_v48  ;;  %v1488_v57 = vld [vmem:[%s1856_s8 + $0x78] sm:$0x1]  ;;  %v697_v60 = vrot.slane %v1486_v51, 1  ;;  %v711_v25 = vrot.slane %v1495_v19, 1  ;;  %v379_v33 = vld [vmem:[%s332_s16 + $0x8] sm:$0x1] }
  0x1c   : > { %v1490_v62 = vld [vmem:[%s1856_s8 + $0x98] sm:$0x1]  ;;  %v695_v63 = vsel %vm398_vm2, %v693_v53, %v694_v54  ;;  %v700_v2 = vrot.slane %v1488_v57, 1  ;;  %v989_v36 = vrot.slane %v378_v31, 1  ;;  %v990_v38 = vrot.slane %v379_v33, 1 }
  0x1d   : > { %1627 = vmatmul.mubr.msk.f32.gmra.mxu0 %vm424_vm3, %v1933_v42  ;;  %v703_v6 = vrot.slane %v1490_v62, 1  ;;  %v1492_v7 = vld [vmem:[%s1856_s8 + $0xb8] sm:$0x1]  ;;  %v698_v8 = vsel %vm398_vm2, %v696_v59, %v697_v60 }
  0x1e   : > { %1644 = vmatmul.mubr.msk.f32.gmra.mxu1 %vm550_vm1, %v1920_v37  ;;  %1629 = vmatprep.mubr.msk.f32.mxu0 %vm424_vm3, %v1939_v45  ;;  %v1494_v10 = vld [vmem:[%s1856_s8 + $0xd8] sm:$0x1]  ;;  %v701_v12 = vsel %vm398_vm2, %v699_v1, %v700_v2  ;;  %v706_v15 = vrot.slane %v1492_v7, 1  ;;  %v991_v39 = vsel %vm398_vm2, %v989_v36, %v990_v38 }
  0x1f   : > { %1662 = vmatprep.mubr.msk.f32.mxu1 %vm550_vm1, %v1481_v40  ;;  %v704_v17 = vsel %vm398_vm2, %v702_v3, %v703_v6  ;;  %v709_v20 = vrot.slane %v1494_v10, 1  ;;  %v1496_v21 = vld [vmem:[%s1856_s8 + $0xf8] sm:$0x1]  ;;  %v1541_v40 = vld [vmem:[%s2151_s3 + $0x8] sm:$0xf] }
  0x20   : > { %v707_v24 = vsel %vm398_vm2, %v705_v13, %v706_v15  ;;  %v712_v26 = vrot.slane %v1496_v21, 1 }
  0x21   : > { %1630 = vmatmul.mubr.msk.f32.gmra.mxu0 %vm424_vm3, %v1952_v52  ;;  %v710_v29 = vsel %vm398_vm2, %v708_v18, %v709_v20 }
  0x22   : > { %1663 = vmatmul.mubr.msk.f32.vlgmr.msra.gmra.mxu1 %vm550_vm1, %v1483_v47  ;;  %1648 = vmatprep.mubr.msk.f32.mxu0 %vm424_vm3, %v692_v55  ;;  %v713_v34 = vsel %vm398_vm2, %v711_v25, %v712_v26 }
  0x23   : > { %1680 = vmatpush3.msra.mxu1 %v1534_v58  ;;  %1665 = vmatprep.mubr.msk.f32.mxu1 %vm550_vm1, %v1485_v50 }
  0x24   : > { %1707 = vmatprep.subr.mxu1 %v1783_v27 }
  0x25   : > { %1649 = vmatmul.mubr.msk.f32.vlgmr.msra.gmra.mxu0 %vm424_vm3, %v695_v63 }
  0x26   : > { %1675 = vmatpush3.msk.msra.mxu0 %vm441_vm0, %v1535_v0  ;;  %1666 = vmatmul.mubr.msk.f32.gmra.mxu1 %vm550_vm1, %v1487_v56 }
  0x27   : > { %1651 = vmatprep.mubr.msk.f32.mxu0 %vm424_vm3, %v698_v8  ;;  %1668 = vmatprep.mubr.msk.f32.mxu1 %vm550_vm1, %v1489_v61 }
  0x28   : > { %1684 = vmatprep.subr.mxu0 %v1783_v27 }
  0x29   : > { %1652 = vmatmul.mubr.msk.f32.gmra.mxu0 %vm424_vm3, %v701_v12 }
  0x2a   : > { %1669 = vmatmul.mubr.msk.f32.gmra.mxu1 %vm550_vm1, %v1491_v4  ;;  %1654 = vmatprep.mubr.msk.f32.mxu0 %vm424_vm3, %v704_v17  ;;  %v2097_v4 = vld [vmem:[%s2152_s4] ss:$0 sm:$0xff] }
  0x2b   : > { %1671 = vmatprep.mubr.msk.f32.mxu1 %vm550_vm1, %v1493_v9 }
  0x2d   : > { %1655 = vmatmul.mubr.msk.f32.gmra.mxu0 %vm424_vm3, %v707_v24 }
  0x2e   : > { %1672 = vmatmul.mubr.msk.f32.gmra.mxu1 %vm550_vm1, %v1495_v19  ;;  %1657 = vmatprep.mubr.msk.f32.mxu0 %vm424_vm3, %v710_v29 }
  0x2f   : > { %1681 = vmatprep.mubr.msk.f32.mxu1 %vm1784_vm4, %v1783_v27 }
  0x31   : > { %1658 = vmatmul.mubr.msk.f32.gmra.mxu0 %vm424_vm3, %v713_v34 }
  0x32   : > { %1682 = vmatmul.mubr.msk.f32.vlgmr.msra.gmra.mxu1 %vm550_vm1, %v378_v31  ;;  %1676 = vmatprep.mubr.msk.f32.mxu0 %vm1784_vm4, %v1783_v27 }
  0x33   : > { %1708 = vmatpush3.msra.mxu1 %v1534_v58  ;;  %1709 = vmatprep.mubr.msk.f32.mxu1 %vm1784_vm4, %v1783_v27 }
  0x35   : > { %1677 = vmatmul.mubr.msk.f32.vlgmr.msra.gmra.mxu0 %vm424_vm3, %v991_v39 }
  0x36   : > { %1685 = vmatpush3.msk.msra.mxu0 %vm441_vm0, %v1541_v40  ;;  %1710 = vmatmul.mubr.msk.f32.vlgmr.msra.gmra.mxu1 %vm550_vm1, %v1860_v5 }
  0x37   : > { %1686 = vmatprep.mubr.msk.f32.mxu0 %vm1784_vm4, %v1783_v27  ;;  %1712 = vmatprep.mubr.msk.f32.mxu1 %vm1784_vm4, %v1783_v27 }
  0x39   : > { %1687 = vmatmul.mubr.msk.f32.vlgmr.msra.gmra.mxu0 %vm424_vm3, %v1890_v23 }
  0x3a   : > { %1713 = vmatmul.mubr.msk.f32.gmra.mxu1 %vm550_vm1, %v1867_v11  ;;  %1689 = vmatprep.mubr.msk.f32.mxu0 %vm1784_vm4, %v1783_v27 }
  0x3b   : > { %1715 = vmatprep.mubr.msk.f32.mxu1 %vm1784_vm4, %v1783_v27 }
  0x3d   : > { %1690 = vmatmul.mubr.msk.f32.gmra.mxu0 %vm424_vm3, %v1898_v28 }
  0x3e   : > { %1716 = vmatmul.mubr.msk.f32.gmra.mxu1 %vm550_vm1, %v1873_v14  ;;  %1692 = vmatprep.mubr.msk.f32.mxu0 %vm1784_vm4, %v1783_v27 }
  0x3f   : > { %1718 = vmatprep.mubr.msk.f32.mxu1 %vm1784_vm4, %v1783_v27 }
  0x41   : > { %1693 = vmatmul.mubr.msk.f32.gmra.mxu0 %vm424_vm3, %v1908_v32 }
  0x42   : > { %1719 = vmatmul.mubr.msk.f32.gmra.mxu1 %vm550_vm1, %v1877_v16  ;;  %1695 = vmatprep.mubr.msk.f32.mxu0 %vm1784_vm4, %v1783_v27 }
  0x43   : > { %1721 = vmatprep.mubr.msk.f32.mxu1 %vm1784_vm4, %v1783_v27 }
  0x45   : > { %1696 = vmatmul.mubr.msk.f32.gmra.mxu0 %vm424_vm3, %v1916_v35 }
  0x46   : > { %1722 = vmatmul.mubr.msk.f32.gmra.mxu1 %vm550_vm1, %v1886_v22  ;;  %1698 = vmatprep.mubr.msk.f32.mxu0 %vm1784_vm4, %v1783_v27 }
  0x47   : > { %1724 = vmatprep.mubr.msk.f32.mxu1 %vm1784_vm4, %v1783_v27 }
  0x49   : > { %1699 = vmatmul.mubr.msk.f32.gmra.mxu0 %vm424_vm3, %v1933_v42 }
  0x4a   : > { %1725 = vmatmul.mubr.msk.f32.gmra.mxu1 %vm550_vm1, %v1901_v30  ;;  %1701 = vmatprep.mubr.msk.f32.mxu0 %vm1784_vm4, %v1783_v27 }
  0x4b   : > { %1727 = vmatprep.mubr.msk.f32.mxu1 %vm1784_vm4, %v1783_v27 }
  0x4d   : > { %1702 = vmatmul.mubr.msk.f32.gmra.mxu0 %vm424_vm3, %v1939_v45 }
  0x4e   : > { %1728 = vmatmul.mubr.msk.f32.gmra.mxu1 %vm550_vm1, %v1920_v37  ;;  %1704 = vmatprep.mubr.msk.f32.mxu0 %vm1784_vm4, %v1783_v27 }
  0x51   : > { %1705 = vmatmul.mubr.msk.f32.gmra.mxu0 %vm424_vm3, %v1952_v52 }
  0xd2   : > { %v1636_v5 = vpop.f32.mrf.mxu1 }
  0xd4   : > { %v633_v11 = vpop.f32.mrf.mxu1 }
  0xd5   : > { %v1622_v14 = vpop.f32.mrf.mxu0 }
  0xd6   : > { %v2071_v16 = vpop.f32.mrf.mxu1  ;;  %v639_v15 = vadd.f32 %v1636_v5, %v1622_v14 }
  0xd7   : > { %v511_v22 = vpop.f32.mrf.mxu0 }
  0xd8   : > { %v643_v23 = vpop.f32.mrf.mxu1  ;;  %v634_v1 = vadd.f32 %v633_v11, %v511_v22 }
  0xd9   : > { %v2073_v28 = vpop.f32.mrf.mxu0 }
  0xda   : > { %v2075_v30 = vpop.f32.mrf.mxu1  ;;  %v649_v22 = vadd.f32 %v2071_v16, %v2073_v28 }
  0xdb   : > { %v521_v32 = vpop.f32.mrf.mxu0 }
  0xdc   : > { %v2077_v35 = vpop.f32.mrf.mxu1  ;;  %v644_v31 = vadd.f32 %v643_v23, %v521_v32 }
  0xdd   : > { %v2079_v37 = vpop.f32.mrf.mxu0 }
  0xde   : > { %v1645_v27 = vpop.f32.mrf.mxu1 }
  0xdf   : > { %v2081_v41 = vpop.f32.mrf.mxu0 }
  0xe0   : > { %v2083_v42 = vpop.f32.mrf.mxu1 }
  0xe1   : > { %v1631_v43 = vpop.f32.mrf.mxu0 }
  0xe2   : > { %v1664_v44 = vpop.f32.mrf.mxu1  ;;  %v669_v60 = vadd.f32 %v1645_v27, %v1631_v43 }
  0xe3   : > { %v2085_v45 = vpop.f32.mrf.mxu0 }
  0xe4   : > { %v922_v46 = vpop.f32.mrf.mxu1 }
  0xe5   : > { %v1650_v47 = vpop.f32.mrf.mxu0 }
  0xe6   : > { %v1667_v48 = vpop.f32.mrf.mxu1  ;;  %v928_v7 = vadd.f32 %v1664_v44, %v1650_v47 }
  0xe7   : > { %v801_v49 = vpop.f32.mrf.mxu0 }
  0xe8   : > { %v932_v50 = vpop.f32.mrf.mxu1  ;;  %v923_v61 = vadd.f32 %v922_v46, %v801_v49  ;;  %v962_v20 = vadd.f32 %v928_v7, %v639_v15 }
  0xe9   : > { %v1653_v51 = vpop.f32.mrf.mxu0 }
  0xea   : > { %v2087_v52 = vpop.f32.mrf.mxu1  ;;  %v961_v8 = vadd.f32 %v923_v61, %v634_v1  ;;  %v938_v38 = vadd.f32 %v1667_v48, %v1653_v51  ;;  %v976_v40 = vadd.f32 %v2097_v4, %v962_v20  ;;  %v659_v61 = vadd.f32 %v2075_v30, %v2079_v37 }
  0xeb   : > { %v811_v53 = vpop.f32.mrf.mxu0 }
  0xec   : > { %v942_v54 = vpop.f32.mrf.mxu1  ;;  %v933_v21 = vadd.f32 %v932_v50, %v811_v53  ;;  %v975_v24 = vadd.f32 %v2097_v4, %v961_v8  ;;  %v964_v32 = vadd.f32 %v938_v38, %v649_v22  ;;  %v654_v50 = vadd.f32 %v2077_v35, %v2081_v41 }
  0xed   : > { %v1656_v55 = vpop.f32.mrf.mxu0 }
  0xee   : > { %v1673_v56 = vpop.f32.mrf.mxu1  ;;  %v963_v39 = vadd.f32 %v933_v21, %v644_v31  ;;  %v948_v28 = vadd.f32 %v2087_v52, %v1656_v55 }
  0xef   : > { %v821_v57 = vpop.f32.mrf.mxu0 }
  0xf0   : > { %v2089_v58 = vpop.f32.mrf.mxu1  ;;  %v943_v44 = vadd.f32 %v942_v54, %v821_v57  ;;  %v977_v46 = vadd.f32 %v2097_v4, %v963_v39  ;;  %v978_v54 = vadd.f32 %v2097_v4, %v964_v32 }
  0xf1   : > { %v1659_v59 = vpop.f32.mrf.mxu0 }
  0xf2   : > { %v958_v62 = vadd.f32 %v1673_v56, %v1659_v59  ;;  %v1135_v63 = vpop.f32.mrf.mxu1  ;;  %v965_v56 = vadd.f32 %v943_v44, %v654_v50 }
  0xf3   : > { %v2091_v0 = vpop.f32.mrf.mxu0 }
  0xf4   : > { %v968_v2 = vadd.f32 %v958_v62, %v669_v60  ;;  %v1683_v3 = vpop.f32.mrf.mxu1  ;;  %v953_v1 = vadd.f32 %v2089_v58, %v2091_v0  ;;  %v979_v52 = vadd.f32 %v2097_v4, %v965_v56 }
  0xf5   : > { %v1063_v6 = vpop.f32.mrf.mxu0 }
  0xf6   : > { %v982_v9 = vadd.f32 %v2097_v4, %v968_v2  ;;  %v1136_v10 = vadd.f32 %v1135_v63, %v1063_v6  ;;  %v1313_v12 = vpop.f32.mrf.mxu1  ;;  %v966_v63 = vadd.f32 %v948_v28, %v659_v61  ;;  %v664_v6 = vadd.f32 %v2083_v42, %v2085_v45 }
  0xf7   : > { %v1678_v13 = vpop.f32.mrf.mxu0 }
  0xf8   : > { %v1139_v17 = vadd.f32 %v1136_v10, %v982_v9  ;;  %v1711_v18 = vpop.f32.mrf.mxu1  ;;  %v967_v8 = vadd.f32 %v953_v1, %v664_v6  ;;  %v980_v58 = vadd.f32 %v2097_v4, %v966_v63 }
  0xf9   : > { %v1213_v19 = vpop.f32.mrf.mxu0 }
  0xfa   : > { %1539 = vst.msk [vmem:[%s2103_s28 + $0x38] sm:$0xff] %vm424_vm3, %v1139_v17  ;;  %v1314_v25 = vadd.f32 %v1313_v12, %v1213_v19  ;;  %v1318_v26 = vpop.f32.mrf.mxu1  ;;  %v981_v17 = vadd.f32 %v2097_v4, %v967_v8 }
  0xfb   : > { %v1688_v29 = vpop.f32.mrf.mxu0 }
  0xfc   : > { %v1347_v33 = vadd.f32 %v1314_v25, %v975_v24  ;;  %v1714_v34 = vpop.f32.mrf.mxu1 }
  0xfd   : > { %v1218_v36 = vpop.f32.mrf.mxu0 }
  0xfe   : > { %1354 = vst.msk [vmem:[%s2103_s28] sm:$0xff] %vm424_vm3, %v1347_v33  ;;  %v1319_v5 = vadd.f32 %v1318_v26, %v1218_v36  ;;  %v1323_v11 = vpop.f32.mrf.mxu1 }
  0xff   : > { %v1691_v14 = vpop.f32.mrf.mxu0 }
 0x100   : > { %v1348_v27 = vadd.f32 %v1319_v5, %v976_v40  ;;  %v1717_v43 = vpop.f32.mrf.mxu1 }
 0x101   : > { %v1223_v23 = vpop.f32.mrf.mxu0 }
 0x102   : > { %1355 = vst.msk [vmem:[%s2103_s28 + $0x8] sm:$0xff] %vm424_vm3, %v1348_v27  ;;  %v1324_v47 = vadd.f32 %v1323_v11, %v1223_v23  ;;  %v1328_v48 = vpop.f32.mrf.mxu1 }
 0x103   : > { %v1694_v49 = vpop.f32.mrf.mxu0 }
 0x104   : > { %v1349_v51 = vadd.f32 %v1324_v47, %v977_v46  ;;  %v1720_v53 = vpop.f32.mrf.mxu1 }
 0x105   : > { %v1228_v16 = vpop.f32.mrf.mxu0 }
 0x106   : > { %1356 = vst.msk [vmem:[%s2103_s28 + $0x10] sm:$0xff] %vm424_vm3, %v1349_v51  ;;  %v1329_v57 = vadd.f32 %v1328_v48, %v1228_v16  ;;  %v1333_v59 = vpop.f32.mrf.mxu1 }
 0x107   : > { %v1697_v60 = vpop.f32.mrf.mxu0 }
 0x108   : > { %v1350_v62 = vadd.f32 %v1329_v57, %v978_v54  ;;  %v1723_v35 = vpop.f32.mrf.mxu1 }
 0x109   : > { %v1233_v41 = vpop.f32.mrf.mxu0 }
 0x10a   : > { %1357 = vst.msk [vmem:[%s2103_s28 + $0x18] sm:$0xff] %vm424_vm3, %v1350_v62  ;;  %v1334_v55 = vadd.f32 %v1333_v59, %v1233_v41  ;;  %v1338_v2 = vpop.f32.mrf.mxu1 }
 0x10b   : > { %v1700_v3 = vpop.f32.mrf.mxu0 }
 0x10c   : > { %v1351_v30 = vadd.f32 %v1334_v55, %v979_v52  ;;  %v1726_v37 = vpop.f32.mrf.mxu1 }
 0x10d   : > { %v1238_v7 = vpop.f32.mrf.mxu0 }
 0x10e   : > { %1358 = vst.msk [vmem:[%s2103_s28 + $0x20] sm:$0xff] %vm424_vm3, %v1351_v30  ;;  %v1339_v0 = vadd.f32 %v1338_v2, %v1238_v7  ;;  %v1343_v9 = vpop.f32.mrf.mxu1 }
 0x10f   : > { %v1703_v10 = vpop.f32.mrf.mxu0 }
 0x110   : > { %v1352_v12 = vadd.f32 %v1339_v0, %v980_v58  ;;  %v1729_v13 = vpop.f32.mrf.mxu1 }
 0x111   : > { %v1243_v15 = vpop.f32.mrf.mxu0 }
 0x112   : > { %1359 = vst.msk [vmem:[%s2103_s28 + $0x28] sm:$0xff] %vm424_vm3, %v1352_v12  ;;  %v1344_v42 = vadd.f32 %v1343_v9, %v1243_v15 }
 0x113   : > { %v1706_v45 = vpop.f32.mrf.mxu0 }
 0x114   : > { %v1353_v18 = vadd.f32 %v1344_v42, %v981_v17 }
 0x116   : > { %1360 = vst.msk [vmem:[%s2103_s28 + $0x30] sm:$0xff] %vm424_vm3, %v1353_v18 }
 0x117 PF: > { %s15_s20 = sadd.s32 1, %s1781_s20   ;;  %s2154_s18 = smov %s1777_s19 }
 0x118   : > { %p12_p5 = scmp.ge.s32.totalorder %s15_s20, 4   ;;  %s2155_s19 = smov %s2157_s21 }
 0x11a   :  { %14 = sbr.rel (!%p12_p5) target bundleno = 2 (0x2), region = 79 }

// kernel: tpu_custom_call.1
= control target key start
LH: loop header
LB: loop body
LE: loop exit
PB: predicated region body
PF: predicated region fallthrough
CT: control target
= control target key end

     0   :  { %s1815_s18 = smov 0   ;;  %s1817_s19 = smov 0   ;;  %s2148_s0 = inlined_call_operand.vmem [shape: f32[2,9,2,9,8], index: 0, kind: input, shape index: {}]   ;;  %s2149_s1 = inlined_call_operand.vmem [shape: f32[2,9,2,9,8], index: 1, kind: input, shape index: {}]   ;;  %s2150_s2 = inlined_call_operand.vmem [shape: f32[3,8,4], index: 2, kind: input, shape index: {}]   ;;  %s2151_s3 = inlined_call_operand.vmem [shape: f32[3,4,4], index: 3, kind: input, shape index: {}]   ;;  %s2152_s4 = inlined_call_operand.vmem [shape: f32[1,4], index: 4, kind: input, shape index: {}]   ;;  %s2153_s5 = inlined_call_operand.vmem [shape: f32[2,8,8,4], index: 5, kind: output, shape index: {}]  }
   0x1   :  { %s1819_s20 = smov 0  }
   0x2 LB: > { %s27_s21 = sadd.s32 1, %s1777_s19  ;;  %p1476_p0 = scmp.ge.s32.totalorder %s1781_s20, 1  ;;  %s1781_s20 = sphi %s1819_s20, %s15_s20   ;;  %s1777_s19 = sphi %s1817_s19, %s2155_s19   ;;  %s1773_s18 = sphi %s1815_s18, %s2154_s18  }
   0x3   : > { %p29_p1 = scmp.ge.s32.totalorder %s27_s21, 2  ;;  %p245_p2 = scmp.lt.s32.totalorder %s1781_s20, 3 }
   0x5   : > { %s2157_s21 = smov (%p29_p1, %s27_s21), 0  ;;  %p246_p3 = pnand %p1476_p0, %p245_p2 }
   0x6   : > { %p306_p4 = scmp.lt.s32.totalorder (!%p246_p3), %s1773_s18, 1 }
   0x7   : > { %249 = sbr.rel (%p246_p3) target bundleno = 279 (0x117), region = 40 }
   0xc   : > { %v381_v0 = vld [vmem:[%s2150_s2] sm:$0xff]  ;;  %vm441_vm0 = vcmask 1043456   ;;  %v1514_v3 = vld [vmem:[%s2150_s2 + $0x8] sm:$0xff]  ;;  %s2159_s18 = smov (!%p306_p4, %s1773_s18), 1  ;;  %vm550_vm1 = vcmask 64512   ;;  %vm398_vm2 = vcmask 1046528  }
   0xd   : > { %v423_v1 = vld [vmem:[%s2151_s3] sm:$0xf]  ;;  %1632 = vmatprep.subr.mxu1 %v381_v0  ;;  %v1515_v2 = vld [vmem:[%s2151_s3 + $0x4] sm:$0xf]  ;;  %s1730_s30 = smul.u32 288, %s2159_s18  ;;  %vm424_vm3 = vcmask 31744  }
   0xe   : > { %1618 = vmatprep.subr.msk.mxu0 %vm441_vm0, %v423_v1  ;;  %1633 = vmatpush3.msra.mxu1 %v381_v0  ;;  %v1783_v27 = vmov 0.0   ;;  %v1534_v58 = vld [vmem:[%s2150_s2 + $0x10] sm:$0xff]  ;;  %v1535_v0 = vld [vmem:[%s2151_s3 + $0x8] sm:$0xf]  ;;  %vm1784_vm4 = vmmov 0   ;;  %s1561_s23 = sshll.u32 %s2159_s18, 6 }
   0xf   : > { %1619 = vmatpush3.msk.msra.mxu0 %vm441_vm0, %v423_v1  ;;  %1660 = vmatprep.subr.mxu1 %v1514_v3  ;;  %s1856_s8 = scalar_lea.vmem %s2148_s0, %s1730_s30  ;;  %s1560_s13 = sadd.s32 256, %s1730_s30 }
  0x10   : > { %1646 = vmatprep.subr.msk.mxu0 %vm441_vm0, %v1515_v2  ;;  %v345_v4 = vld [vmem:[%s1856_s8] sm:$0xff]  ;;  %v346_v6 = vld [vmem:[%s1856_s8 + $0x8] sm:$0x1]  ;;  %v1481_v40 = vld [vmem:[%s1856_s8 + $0x10] sm:$0xff]  ;;  %s332_s16 = scalar_lea.vmem %s2149_s1, %s1560_s13  ;;  %s2103_s28 = scalar_lea.vmem %s2153_s5, %s1561_s23 }
  0x11   : > { %v1860_v5 = vld [vmem:[%s1856_s8 + $0x20] sm:$0xff]  ;;  %v399_v7 = vrot.slane %v345_v4, 1  ;;  %1634 = vmatprep.mubr.msk.f32.mxu1 %vm550_vm1, %v345_v4  ;;  %v400_v9 = vrot.slane %v346_v6, 1  ;;  %v348_v10 = vld [vmem:[%s1856_s8 + $0x28] sm:$0x1]  ;;  %v690_v46 = vrot.slane %v1481_v40, 1 }
  0x12   : > { %v402_v8 = vrot.slane %v1860_v5, 1  ;;  %v1867_v11 = vld [vmem:[%s1856_s8 + $0x40] sm:$0xff]  ;;  %1635 = vmatmul.mubr.msk.f32.vlgmr.msra.gmra.mxu1 %vm550_vm1, %v1860_v5  ;;  %v403_v12 = vrot.slane %v348_v10, 1  ;;  %v350_v15 = vld [vmem:[%s1856_s8 + $0x48] sm:$0x1]  ;;  %v1483_v47 = vld [vmem:[%s1856_s8 + $0x30] sm:$0xff] }
  0x13   : > { %v405_v13 = vrot.slane %v1867_v11, 1  ;;  %v1873_v14 = vld [vmem:[%s1856_s8 + $0x60] sm:$0xff]  ;;  %v401_v17 = vsel %vm398_vm2, %v399_v7, %v400_v9  ;;  %1661 = vmatpush3.msra.mxu1 %v1514_v3  ;;  %1637 = vmatprep.mubr.msk.f32.mxu1 %vm550_vm1, %v1867_v11  ;;  %v406_v19 = vrot.slane %v350_v15, 1  ;;  %v352_v20 = vld [vmem:[%s1856_s8 + $0x68] sm:$0x1]  ;;  %v1485_v50 = vld [vmem:[%s1856_s8 + $0x50] sm:$0xff] }
  0x14   : > { %v1877_v16 = vld [vmem:[%s1856_s8 + $0x80] sm:$0xff]  ;;  %v408_v18 = vrot.slane %v1873_v14, 1  ;;  %1620 = vmatprep.mubr.msk.f32.mxu0 %vm424_vm3, %v401_v17  ;;  %v1890_v23 = vsel %vm398_vm2, %v402_v8, %v403_v12  ;;  %v409_v24 = vrot.slane %v352_v20, 1  ;;  %v354_v25 = vld [vmem:[%s1856_s8 + $0x88] sm:$0x1]  ;;  %1679 = vmatprep.subr.mxu1 %v1783_v27  ;;  %v693_v53 = vrot.slane %v1483_v47, 1 }
  0x15   : > { %v411_v21 = vrot.slane %v1877_v16, 1  ;;  %v1886_v22 = vld [vmem:[%s1856_s8 + $0xa0] sm:$0xff]  ;;  %v356_v26 = vld [vmem:[%s1856_s8 + $0xa8] sm:$0x1]  ;;  %1621 = vmatmul.mubr.msk.f32.vlgmr.msra.gmra.mxu0 %vm424_vm3, %v1890_v23  ;;  %v1898_v28 = vsel %vm398_vm2, %v405_v13, %v406_v19  ;;  %v412_v29 = vrot.slane %v354_v25, 1  ;;  %v1487_v56 = vld [vmem:[%s1856_s8 + $0x70] sm:$0xff] }
  0x16   : > { %v1901_v30 = vld [vmem:[%s1856_s8 + $0xc0] sm:$0xff]  ;;  %v358_v31 = vld [vmem:[%s1856_s8 + $0xc8] sm:$0x1]  ;;  %1647 = vmatpush3.msk.msra.mxu0 %vm441_vm0, %v1515_v2  ;;  %1638 = vmatmul.mubr.msk.f32.gmra.mxu1 %vm550_vm1, %v1873_v14  ;;  %v1908_v32 = vsel %vm398_vm2, %v408_v18, %v409_v24  ;;  %v414_v33 = vrot.slane %v1886_v22, 1  ;;  %v415_v34 = vrot.slane %v356_v26, 1  ;;  %v696_v59 = vrot.slane %v1485_v50, 1 }
  0x17   : > { %1623 = vmatprep.mubr.msk.f32.mxu0 %vm424_vm3, %v1898_v28  ;;  %1640 = vmatprep.mubr.msk.f32.mxu1 %vm550_vm1, %v1877_v16  ;;  %v1916_v35 = vsel %vm398_vm2, %v411_v21, %v412_v29  ;;  %v417_v36 = vrot.slane %v1901_v30, 1  ;;  %v1920_v37 = vld [vmem:[%s1856_s8 + $0xe0] sm:$0xff]  ;;  %v418_v38 = vrot.slane %v358_v31, 1  ;;  %v360_v39 = vld [vmem:[%s1856_s8 + $0xe8] sm:$0x1]  ;;  %v1489_v61 = vld [vmem:[%s1856_s8 + $0x90] sm:$0xff] }
  0x18   : > { %v1482_v41 = vld [vmem:[%s1856_s8 + $0x18] sm:$0x1]  ;;  %1674 = vmatprep.subr.mxu0 %v1783_v27  ;;  %v1933_v42 = vsel %vm398_vm2, %v414_v33, %v415_v34  ;;  %v420_v43 = vrot.slane %v1920_v37, 1  ;;  %v421_v44 = vrot.slane %v360_v39, 1  ;;  %v699_v1 = vrot.slane %v1487_v56, 1  ;;  %v1491_v4 = vld [vmem:[%s1856_s8 + $0xb0] sm:$0xff] }
  0x19   : > { %1624 = vmatmul.mubr.msk.f32.gmra.mxu0 %vm424_vm3, %v1908_v32  ;;  %v1939_v45 = vsel %vm398_vm2, %v417_v36, %v418_v38  ;;  %v691_v48 = vrot.slane %v1482_v41, 1  ;;  %v1484_v49 = vld [vmem:[%s1856_s8 + $0x38] sm:$0x1]  ;;  %v702_v3 = vrot.slane %v1489_v61, 1  ;;  %v1493_v9 = vld [vmem:[%s1856_s8 + $0xd0] sm:$0xff]  ;;  %v705_v13 = vrot.slane %v1491_v4, 1 }
  0x1a   : > { %1641 = vmatmul.mubr.msk.f32.gmra.mxu1 %vm550_vm1, %v1886_v22  ;;  %1626 = vmatprep.mubr.msk.f32.mxu0 %vm424_vm3, %v1916_v35  ;;  %v1486_v51 = vld [vmem:[%s1856_s8 + $0x58] sm:$0x1]  ;;  %v1952_v52 = vsel %vm398_vm2, %v420_v43, %v421_v44  ;;  %v694_v54 = vrot.slane %v1484_v49, 1  ;;  %v708_v18 = vrot.slane %v1493_v9, 1  ;;  %v1495_v19 = vld [vmem:[%s1856_s8 + $0xf0] sm:$0xff]  ;;  %v378_v31 = vld [vmem:[%s332_s16] sm:$0xff] }
  0x1b   : > { %1643 = vmatprep.mubr.msk.f32.mxu1 %vm550_vm1, %v1901_v30  ;;  %v692_v55 = vsel %vm398_vm2, %v690_v46, %v691_v48  ;;  %v1488_v57 = vld [vmem:[%s1856_s8 + $0x78] sm:$0x1]  ;;  %v697_v60 = vrot.slane %v1486_v51, 1  ;;  %v711_v25 = vrot.slane %v1495_v19, 1  ;;  %v379_v33 = vld [vmem:[%s332_s16 + $0x8] sm:$0x1] }
  0x1c   : > { %v1490_v62 = vld [vmem:[%s1856_s8 + $0x98] sm:$0x1]  ;;  %v695_v63 = vsel %vm398_vm2, %v693_v53, %v694_v54  ;;  %v700_v2 = vrot.slane %v1488_v57, 1  ;;  %v989_v36 = vrot.slane %v378_v31, 1  ;;  %v990_v38 = vrot.slane %v379_v33, 1 }
  0x1d   : > { %1627 = vmatmul.mubr.msk.f32.gmra.mxu0 %vm424_vm3, %v1933_v42  ;;  %v703_v6 = vrot.slane %v1490_v62, 1  ;;  %v1492_v7 = vld [vmem:[%s1856_s8 + $0xb8] sm:$0x1]  ;;  %v698_v8 = vsel %vm398_vm2, %v696_v59, %v697_v60 }
  0x1e   : > { %1644 = vmatmul.mubr.msk.f32.gmra.mxu1 %vm550_vm1, %v1920_v37  ;;  %1629 = vmatprep.mubr.msk.f32.mxu0 %vm424_vm3, %v1939_v45  ;;  %v1494_v10 = vld [vmem:[%s1856_s8 + $0xd8] sm:$0x1]  ;;  %v701_v12 = vsel %vm398_vm2, %v699_v1, %v700_v2  ;;  %v706_v15 = vrot.slane %v1492_v7, 1  ;;  %v991_v39 = vsel %vm398_vm2, %v989_v36, %v990_v38 }
  0x1f   : > { %1662 = vmatprep.mubr.msk.f32.mxu1 %vm550_vm1, %v1481_v40  ;;  %v704_v17 = vsel %vm398_vm2, %v702_v3, %v703_v6  ;;  %v709_v20 = vrot.slane %v1494_v10, 1  ;;  %v1496_v21 = vld [vmem:[%s1856_s8 + $0xf8] sm:$0x1]  ;;  %v1541_v40 = vld [vmem:[%s2151_s3 + $0x8] sm:$0xf] }
  0x20   : > { %v707_v24 = vsel %vm398_vm2, %v705_v13, %v706_v15  ;;  %v712_v26 = vrot.slane %v1496_v21, 1 }
  0x21   : > { %1630 = vmatmul.mubr.msk.f32.gmra.mxu0 %vm424_vm3, %v1952_v52  ;;  %v710_v29 = vsel %vm398_vm2, %v708_v18, %v709_v20 }
  0x22   : > { %1663 = vmatmul.mubr.msk.f32.vlgmr.msra.gmra.mxu1 %vm550_vm1, %v1483_v47  ;;  %1648 = vmatprep.mubr.msk.f32.mxu0 %vm424_vm3, %v692_v55  ;;  %v713_v34 = vsel %vm398_vm2, %v711_v25, %v712_v26 }
  0x23   : > { %1680 = vmatpush3.msra.mxu1 %v1534_v58  ;;  %1665 = vmatprep.mubr.msk.f32.mxu1 %vm550_vm1, %v1485_v50 }
  0x24   : > { %1707 = vmatprep.subr.mxu1 %v1783_v27 }
  0x25   : > { %1649 = vmatmul.mubr.msk.f32.vlgmr.msra.gmra.mxu0 %vm424_vm3, %v695_v63 }
  0x26   : > { %1675 = vmatpush3.msk.msra.mxu0 %vm441_vm0, %v1535_v0  ;;  %1666 = vmatmul.mubr.msk.f32.gmra.mxu1 %vm550_vm1, %v1487_v56 }
  0x27   : > { %1651 = vmatprep.mubr.msk.f32.mxu0 %vm424_vm3, %v698_v8  ;;  %1668 = vmatprep.mubr.msk.f32.mxu1 %vm550_vm1, %v1489_v61 }
  0x28   : > { %1684 = vmatprep.subr.mxu0 %v1783_v27 }
  0x29   : > { %1652 = vmatmul.mubr.msk.f32.gmra.mxu0 %vm424_vm3, %v701_v12 }
  0x2a   : > { %1669 = vmatmul.mubr.msk.f32.gmra.mxu1 %vm550_vm1, %v1491_v4  ;;  %1654 = vmatprep.mubr.msk.f32.mxu0 %vm424_vm3, %v704_v17  ;;  %v2097_v4 = vld [vmem:[%s2152_s4] ss:$0 sm:$0xff] }
  0x2b   : > { %1671 = vmatprep.mubr.msk.f32.mxu1 %vm550_vm1, %v1493_v9 }
  0x2d   : > { %1655 = vmatmul.mubr.msk.f32.gmra.mxu0 %vm424_vm3, %v707_v24 }
  0x2e   : > { %1672 = vmatmul.mubr.msk.f32.gmra.mxu1 %vm550_vm1, %v1495_v19  ;;  %1657 = vmatprep.mubr.msk.f32.mxu0 %vm424_vm3, %v710_v29 }
  0x2f   : > { %1681 = vmatprep.mubr.msk.f32.mxu1 %vm1784_vm4, %v1783_v27 }
  0x31   : > { %1658 = vmatmul.mubr.msk.f32.gmra.mxu0 %vm424_vm3, %v713_v34 }
  0x32   : > { %1682 = vmatmul.mubr.msk.f32.vlgmr.msra.gmra.mxu1 %vm550_vm1, %v378_v31  ;;  %1676 = vmatprep.mubr.msk.f32.mxu0 %vm1784_vm4, %v1783_v27 }
  0x33   : > { %1708 = vmatpush3.msra.mxu1 %v1534_v58  ;;  %1709 = vmatprep.mubr.msk.f32.mxu1 %vm1784_vm4, %v1783_v27 }
  0x35   : > { %1677 = vmatmul.mubr.msk.f32.vlgmr.msra.gmra.mxu0 %vm424_vm3, %v991_v39 }
  0x36   : > { %1685 = vmatpush3.msk.msra.mxu0 %vm441_vm0, %v1541_v40  ;;  %1710 = vmatmul.mubr.msk.f32.vlgmr.msra.gmra.mxu1 %vm550_vm1, %v1860_v5 }
  0x37   : > { %1686 = vmatprep.mubr.msk.f32.mxu0 %vm1784_vm4, %v1783_v27  ;;  %1712 = vmatprep.mubr.msk.f32.mxu1 %vm1784_vm4, %v1783_v27 }
  0x39   : > { %1687 = vmatmul.mubr.msk.f32.vlgmr.msra.gmra.mxu0 %vm424_vm3, %v1890_v23 }
  0x3a   : > { %1713 = vmatmul.mubr.msk.f32.gmra.mxu1 %vm550_vm1, %v1867_v11  ;;  %1689 = vmatprep.mubr.msk.f32.mxu0 %vm1784_vm4, %v1783_v27 }
  0x3b   : > { %1715 = vmatprep.mubr.msk.f32.mxu1 %vm1784_vm4, %v1783_v27 }
  0x3d   : > { %1690 = vmatmul.mubr.msk.f32.gmra.mxu0 %vm424_vm3, %v1898_v28 }
  0x3e   : > { %1716 = vmatmul.mubr.msk.f32.gmra.mxu1 %vm550_vm1, %v1873_v14  ;;  %1692 = vmatprep.mubr.msk.f32.mxu0 %vm1784_vm4, %v1783_v27 }
  0x3f   : > { %1718 = vmatprep.mubr.msk.f32.mxu1 %vm1784_vm4, %v1783_v27 }
  0x41   : > { %1693 = vmatmul.mubr.msk.f32.gmra.mxu0 %vm424_vm3, %v1908_v32 }
  0x42   : > { %1719 = vmatmul.mubr.msk.f32.gmra.mxu1 %vm550_vm1, %v1877_v16  ;;  %1695 = vmatprep.mubr.msk.f32.mxu0 %vm1784_vm4, %v1783_v27 }
  0x43   : > { %1721 = vmatprep.mubr.msk.f32.mxu1 %vm1784_vm4, %v1783_v27 }
  0x45   : > { %1696 = vmatmul.mubr.msk.f32.gmra.mxu0 %vm424_vm3, %v1916_v35 }
  0x46   : > { %1722 = vmatmul.mubr.msk.f32.gmra.mxu1 %vm550_vm1, %v1886_v22  ;;  %1698 = vmatprep.mubr.msk.f32.mxu0 %vm1784_vm4, %v1783_v27 }
  0x47   : > { %1724 = vmatprep.mubr.msk.f32.mxu1 %vm1784_vm4, %v1783_v27 }
  0x49   : > { %1699 = vmatmul.mubr.msk.f32.gmra.mxu0 %vm424_vm3, %v1933_v42 }
  0x4a   : > { %1725 = vmatmul.mubr.msk.f32.gmra.mxu1 %vm550_vm1, %v1901_v30  ;;  %1701 = vmatprep.mubr.msk.f32.mxu0 %vm1784_vm4, %v1783_v27 }
  0x4b   : > { %1727 = vmatprep.mubr.msk.f32.mxu1 %vm1784_vm4, %v1783_v27 }
  0x4d   : > { %1702 = vmatmul.mubr.msk.f32.gmra.mxu0 %vm424_vm3, %v1939_v45 }
  0x4e   : > { %1728 = vmatmul.mubr.msk.f32.gmra.mxu1 %vm550_vm1, %v1920_v37  ;;  %1704 = vmatprep.mubr.msk.f32.mxu0 %vm1784_vm4, %v1783_v27 }
  0x51   : > { %1705 = vmatmul.mubr.msk.f32.gmra.mxu0 %vm424_vm3, %v1952_v52 }
  0xd2   : > { %v1636_v5 = vpop.f32.mrf.mxu1 }
  0xd4   : > { %v633_v11 = vpop.f32.mrf.mxu1 }
  0xd5   : > { %v1622_v14 = vpop.f32.mrf.mxu0 }
  0xd6   : > { %v2071_v16 = vpop.f32.mrf.mxu1  ;;  %v639_v15 = vadd.f32 %v1636_v5, %v1622_v14 }
  0xd7   : > { %v511_v22 = vpop.f32.mrf.mxu0 }
  0xd8   : > { %v643_v23 = vpop.f32.mrf.mxu1  ;;  %v634_v1 = vadd.f32 %v633_v11, %v511_v22 }
  0xd9   : > { %v2073_v28 = vpop.f32.mrf.mxu0 }
  0xda   : > { %v2075_v30 = vpop.f32.mrf.mxu1  ;;  %v649_v22 = vadd.f32 %v2071_v16, %v2073_v28 }
  0xdb   : > { %v521_v32 = vpop.f32.mrf.mxu0 }
  0xdc   : > { %v2077_v35 = vpop.f32.mrf.mxu1  ;;  %v644_v31 = vadd.f32 %v643_v23, %v521_v32 }
  0xdd   : > { %v2079_v37 = vpop.f32.mrf.mxu0 }
  0xde   : > { %v1645_v27 = vpop.f32.mrf.mxu1 }
  0xdf   : > { %v2081_v41 = vpop.f32.mrf.mxu0 }
  0xe0   : > { %v2083_v42 = vpop.f32.mrf.mxu1 }
  0xe1   : > { %v1631_v43 = vpop.f32.mrf.mxu0 }
  0xe2   : > { %v1664_v44 = vpop.f32.mrf.mxu1  ;;  %v669_v60 = vadd.f32 %v1645_v27, %v1631_v43 }
  0xe3   : > { %v2085_v45 = vpop.f32.mrf.mxu0 }
  0xe4   : > { %v922_v46 = vpop.f32.mrf.mxu1 }
  0xe5   : > { %v1650_v47 = vpop.f32.mrf.mxu0 }
  0xe6   : > { %v1667_v48 = vpop.f32.mrf.mxu1  ;;  %v928_v7 = vadd.f32 %v1664_v44, %v1650_v47 }
  0xe7   : > { %v801_v49 = vpop.f32.mrf.mxu0 }
  0xe8   : > { %v932_v50 = vpop.f32.mrf.mxu1  ;;  %v923_v61 = vadd.f32 %v922_v46, %v801_v49  ;;  %v962_v20 = vadd.f32 %v928_v7, %v639_v15 }
  0xe9   : > { %v1653_v51 = vpop.f32.mrf.mxu0 }
  0xea   : > { %v2087_v52 = vpop.f32.mrf.mxu1  ;;  %v961_v8 = vadd.f32 %v923_v61, %v634_v1  ;;  %v938_v38 = vadd.f32 %v1667_v48, %v1653_v51  ;;  %v976_v40 = vadd.f32 %v2097_v4, %v962_v20  ;;  %v659_v61 = vadd.f32 %v2075_v30, %v2079_v37 }
  0xeb   : > { %v811_v53 = vpop.f32.mrf.mxu0 }
  0xec   : > { %v942_v54 = vpop.f32.mrf.mxu1  ;;  %v933_v21 = vadd.f32 %v932_v50, %v811_v53  ;;  %v975_v24 = vadd.f32 %v2097_v4, %v961_v8  ;;  %v964_v32 = vadd.f32 %v938_v38, %v649_v22  ;;  %v654_v50 = vadd.f32 %v2077_v35, %v2081_v41 }
  0xed   : > { %v1656_v55 = vpop.f32.mrf.mxu0 }
  0xee   : > { %v1673_v56 = vpop.f32.mrf.mxu1  ;;  %v963_v39 = vadd.f32 %v933_v21, %v644_v31  ;;  %v948_v28 = vadd.f32 %v2087_v52, %v1656_v55 }
  0xef   : > { %v821_v57 = vpop.f32.mrf.mxu0 }
  0xf0   : > { %v2089_v58 = vpop.f32.mrf.mxu1  ;;  %v943_v44 = vadd.f32 %v942_v54, %v821_v57  ;;  %v977_v46 = vadd.f32 %v2097_v4, %v963_v39  ;;  %v978_v54 = vadd.f32 %v2097_v4, %v964_v32 }
  0xf1   : > { %v1659_v59 = vpop.f32.mrf.mxu0 }
  0xf2   : > { %v958_v62 = vadd.f32 %v1673_v56, %v1659_v59  ;;  %v1135_v63 = vpop.f32.mrf.mxu1  ;;  %v965_v56 = vadd.f32 %v943_v44, %v654_v50 }
  0xf3   : > { %v2091_v0 = vpop.f32.mrf.mxu0 }
  0xf4   : > { %v968_v2 = vadd.f32 %v958_v62, %v669_v60  ;;  %v1683_v3 = vpop.f32.mrf.mxu1  ;;  %v953_v1 = vadd.f32 %v2089_v58, %v2091_v0  ;;  %v979_v52 = vadd.f32 %v2097_v4, %v965_v56 }
  0xf5   : > { %v1063_v6 = vpop.f32.mrf.mxu0 }
  0xf6   : > { %v982_v9 = vadd.f32 %v2097_v4, %v968_v2  ;;  %v1136_v10 = vadd.f32 %v1135_v63, %v1063_v6  ;;  %v1313_v12 = vpop.f32.mrf.mxu1  ;;  %v966_v63 = vadd.f32 %v948_v28, %v659_v61  ;;  %v664_v6 = vadd.f32 %v2083_v42, %v2085_v45 }
  0xf7   : > { %v1678_v13 = vpop.f32.mrf.mxu0 }
  0xf8   : > { %v1139_v17 = vadd.f32 %v1136_v10, %v982_v9  ;;  %v1711_v18 = vpop.f32.mrf.mxu1  ;;  %v967_v8 = vadd.f32 %v953_v1, %v664_v6  ;;  %v980_v58 = vadd.f32 %v2097_v4, %v966_v63 }
  0xf9   : > { %v1213_v19 = vpop.f32.mrf.mxu0 }
  0xfa   : > { %1539 = vst.msk [vmem:[%s2103_s28 + $0x38] sm:$0xff] %vm424_vm3, %v1139_v17  ;;  %v1314_v25 = vadd.f32 %v1313_v12, %v1213_v19  ;;  %v1318_v26 = vpop.f32.mrf.mxu1  ;;  %v981_v17 = vadd.f32 %v2097_v4, %v967_v8 }
  0xfb   : > { %v1688_v29 = vpop.f32.mrf.mxu0 }
  0xfc   : > { %v1347_v33 = vadd.f32 %v1314_v25, %v975_v24  ;;  %v1714_v34 = vpop.f32.mrf.mxu1 }
  0xfd   : > { %v1218_v36 = vpop.f32.mrf.mxu0 }
  0xfe   : > { %1354 = vst.msk [vmem:[%s2103_s28] sm:$0xff] %vm424_vm3, %v1347_v33  ;;  %v1319_v5 = vadd.f32 %v1318_v26, %v1218_v36  ;;  %v1323_v11 = vpop.f32.mrf.mxu1 }
  0xff   : > { %v1691_v14 = vpop.f32.mrf.mxu0 }
 0x100   : > { %v1348_v27 = vadd.f32 %v1319_v5, %v976_v40  ;;  %v1717_v43 = vpop.f32.mrf.mxu1 }
 0x101   : > { %v1223_v23 = vpop.f32.mrf.mxu0 }
 0x102   : > { %1355 = vst.msk [vmem:[%s2103_s28 + $0x8] sm:$0xff] %vm424_vm3, %v1348_v27  ;;  %v1324_v47 = vadd.f32 %v1323_v11, %v1223_v23  ;;  %v1328_v48 = vpop.f32.mrf.mxu1 }
 0x103   : > { %v1694_v49 = vpop.f32.mrf.mxu0 }
 0x104   : > { %v1349_v51 = vadd.f32 %v1324_v47, %v977_v46  ;;  %v1720_v53 = vpop.f32.mrf.mxu1 }
 0x105   : > { %v1228_v16 = vpop.f32.mrf.mxu0 }
 0x106   : > { %1356 = vst.msk [vmem:[%s2103_s28 + $0x10] sm:$0xff] %vm424_vm3, %v1349_v51  ;;  %v1329_v57 = vadd.f32 %v1328_v48, %v1228_v16  ;;  %v1333_v59 = vpop.f32.mrf.mxu1 }
 0x107   : > { %v1697_v60 = vpop.f32.mrf.mxu0 }
 0x108   : > { %v1350_v62 = vadd.f32 %v1329_v57, %v978_v54  ;;  %v1723_v35 = vpop.f32.mrf.mxu1 }
 0x109   : > { %v1233_v41 = vpop.f32.mrf.mxu0 }
 0x10a   : > { %1357 = vst.msk [vmem:[%s2103_s28 + $0x18] sm:$0xff] %vm424_vm3, %v1350_v62  ;;  %v1334_v55 = vadd.f32 %v1333_v59, %v1233_v41  ;;  %v1338_v2 = vpop.f32.mrf.mxu1 }
 0x10b   : > { %v1700_v3 = vpop.f32.mrf.mxu0 }
 0x10c   : > { %v1351_v30 = vadd.f32 %v1334_v55, %v979_v52  ;;  %v1726_v37 = vpop.f32.mrf.mxu1 }
 0x10d   : > { %v1238_v7 = vpop.f32.mrf.mxu0 }
 0x10e   : > { %1358 = vst.msk [vmem:[%s2103_s28 + $0x20] sm:$0xff] %vm424_vm3, %v1351_v30  ;;  %v1339_v0 = vadd.f32 %v1338_v2, %v1238_v7  ;;  %v1343_v9 = vpop.f32.mrf.mxu1 }
 0x10f   : > { %v1703_v10 = vpop.f32.mrf.mxu0 }
 0x110   : > { %v1352_v12 = vadd.f32 %v1339_v0, %v980_v58  ;;  %v1729_v13 = vpop.f32.mrf.mxu1 }
 0x111   : > { %v1243_v15 = vpop.f32.mrf.mxu0 }
 0x112   : > { %1359 = vst.msk [vmem:[%s2103_s28 + $0x28] sm:$0xff] %vm424_vm3, %v1352_v12  ;;  %v1344_v42 = vadd.f32 %v1343_v9, %v1243_v15 }
 0x113   : > { %v1706_v45 = vpop.f32.mrf.mxu0 }
 0x114   : > { %v1353_v18 = vadd.f32 %v1344_v42, %v981_v17 }
 0x116   : > { %1360 = vst.msk [vmem:[%s2103_s28 + $0x30] sm:$0xff] %vm424_vm3, %v1353_v18 }
 0x117 PF: > { %s15_s20 = sadd.s32 1, %s1781_s20   ;;  %s2154_s18 = smov %s1777_s19 }
 0x118   : > { %p12_p5 = scmp.ge.s32.totalorder %s15_s20, 4   ;;  %s2155_s19 = smov %s2157_s21 }
 0x11a   :  { %14 = sbr.rel (!%p12_p5) target bundleno = 2 (0x2), region = 79 }

</bundles_post_ra>
